<compile_context>
chip_gen: v7x
topology: tpu7x:2x2x1
jax: 0.10.0
libtpu: 0.0.40
codegen_flags: <defaults>
</compile_context>

<pallas_src>
from functools import partial

import jax
import jax.numpy as jnp
from jax.experimental import pallas as pl
from jax.experimental.pallas import tpu as pltpu

# ----------------------------- problem sizes (small, synthetic) -----------------
B = 2          # batch
S = 8          # sequence length
V = 32         # vocab size
H = 32         # hidden size
NH = 4         # attention heads
HD = H // NH   # head dim
FF = 64        # FFN intermediate size
LN_EPS = 1e-12 # BERT layernorm eps

# ----------------------------- packed-weight row layout --------------------------
# One lane-dense (W_ROWS, 128) f32 slab holds every parameter -> a single input DMA.
ROW_WATTN = 0              # rows [  0, 32): [wq | wk | wv | wo], 128 lanes
ROW_W1    = ROW_WATTN + H  # rows [ 32, 64): w1, lanes [0, FF)
ROW_W2    = ROW_W1 + H     # rows [ 64,128): w2, lanes [0, H)
ROW_TOKE  = ROW_W2 + FF    # rows [128,160): token embedding (V, H)
ROW_POSE  = ROW_TOKE + V   # rows [160,168): position embedding (S, H)
ROW_VEC   = ROW_POSE + S   # rows [168,180): 12 packed 1-D params, one per row
N_VEC     = 12
W_ROWS    = 184            # padded to a multiple of 8 sublanes


# ----------------------------- kernel helpers ------------------------------------
def _layernorm(x, gamma, beta):
    # gamma/beta are (1, H) 2-D slices; broadcast happens once per call site.
    mu = jnp.mean(x, axis=-1, keepdims=True)
    var = jnp.mean((x - mu) ** 2, axis=-1, keepdims=True)
    return (x - mu) * jax.lax.rsqrt(var + LN_EPS) * gamma + beta


# ----------------------------- fused kernel --------------------------------------
def fused_kernel(logits_ref, w_ref, out_ref):
    bb = logits_ref.shape[0]   # batch elements handled by this grid step (B or B//num_cores)

    # ---- 1. argmax over vocab (ids stay in vregs; emitted bitcast into the output slab) ----
    logits = logits_ref[...]                                          # (bb, S, V)
    viota = jax.lax.broadcasted_iota(jnp.int32, (bb, S, V), 2)
    m = jnp.max(logits, axis=-1, keepdims=True)
    cand = jnp.where(logits == m, viota, jnp.int32(V))                # first max wins
    ids = jnp.min(cand, axis=-1).astype(jnp.int32)                    # (bb, S)

    # TODO(synk): tokenizer.decode / re-tokenize (string processing) has no Pallas
    # equivalent; the argmax token ids feed the encoder directly.

    # ---- unpack parameters: static, sublane-aligned slices of the packed-weight ref ----
    w_attn = w_ref[ROW_WATTN:ROW_WATTN + H, :]                        # (H, 4H) = [wq|wk|wv|wo]
    w1 = w_ref[ROW_W1:ROW_W1 + H, :FF]                                # (H, FF)
    w2 = w_ref[ROW_W2:ROW_W2 + FF, :H]                                # (FF, H)
    tok_emb = w_ref[ROW_TOKE:ROW_TOKE + V, :H]                        # (V, H)
    pos_emb = w_ref[ROW_POSE:ROW_POSE + S, :H]                        # (S, H)
    vp = w_ref[ROW_VEC:ROW_VEC + 16, :]                               # (16, 128), 12 rows used
    # keep every 1-D parameter as a 2-D (1, n) slice -> native layout, single broadcast
    bq, bk, bv, bo = vp[0:1, :H], vp[1:2, :H], vp[2:3, :H], vp[3:4, :H]
    b1, b2 = vp[4:5, :FF], vp[5:6, :H]
    ln_e_g, ln_e_b = vp[6:7, :H], vp[7:8, :H]
    ln1_g, ln1_b = vp[8:9, :H], vp[9:10, :H]
    ln2_g, ln2_b = vp[10:11, :H], vp[11:12, :H]

    # ---- 2. embedding: one-hot matmul keeps the "gather" on the MXU ----
    # TODO(synk): for a real vocab (V~30k) replace with a scalar-prefetch row gather.
    one_hot = (viota == ids[:, :, None]).astype(jnp.float32)          # (bb, S, V)
    x = jnp.einsum('bsv,vh->bsh', one_hot, tok_emb,
                   preferred_element_type=jnp.float32)                # (bb, S, H)
    x = x + pos_emb                                                   # (S, H) broadcast
    x = _layernorm(x, ln_e_g, ln_e_b)

    # ---- 3. multi-head self-attention ----
    # single lane-dense (H, 4H) projection; 1/sqrt(HD) already folded into wq & bq.
    qkv = jnp.einsum('bsh,hd->bsd', x, w_attn,
                     preferred_element_type=jnp.float32)              # (bb, S, 4H)
    q = qkv[..., 0 * H:1 * H] + bq
    k = qkv[..., 1 * H:2 * H] + bk
    v = qkv[..., 2 * H:3 * H] + bv
    wo = w_attn[:, 3 * H:4 * H]                                       # (H, H)

    # heads -> leading batch axis: one batched score matmul + one batched ctx matmul
    # (instead of 2 tiny pushes per head), then ONE output projection.
    qh = jnp.concatenate([q[..., h * HD:(h + 1) * HD] for h in range(NH)], axis=0)
    kh = jnp.concatenate([k[..., h * HD:(h + 1) * HD] for h in range(NH)], axis=0)
    vh = jnp.concatenate([v[..., h * HD:(h + 1) * HD] for h in range(NH)], axis=0)
    s = jnp.einsum('bqd,bkd->bqk', qh, kh,
                   preferred_element_type=jnp.float32)                # (NH*bb, S, S)
    s = s - jnp.max(s, axis=-1, keepdims=True)
    p = jnp.exp(s)
    p = p * pl.reciprocal(jnp.sum(p, axis=-1, keepdims=True), approx=True)
    ch = jnp.einsum('bqk,bkd->bqd', p, vh,
                    preferred_element_type=jnp.float32)               # (NH*bb, S, HD)
    # heads back onto lanes, then a single (H, H) output projection
    ctx = jnp.concatenate([ch[h * bb:(h + 1) * bb] for h in range(NH)], axis=-1)  # (bb,S,H)
    attn = jnp.einsum('bsh,hk->bsk', ctx, wo,
                      preferred_element_type=jnp.float32) + bo
    x = _layernorm(x + attn, ln1_g, ln1_b)

    # ---- 4. feed-forward ----
    hdn = jnp.einsum('bsh,hf->bsf', x, w1,
                     preferred_element_type=jnp.float32) + b1
    # TODO(synk): HF BERT uses exact erf GELU; tanh approximation used here (EUP path).
    hdn = jax.nn.gelu(hdn, approximate=True)
    ffn = jnp.einsum('bsf,fh->bsh', hdn, w2,
                     preferred_element_type=jnp.float32) + b2
    x = _layernorm(x + ffn, ln2_g, ln2_b)

    # ---- 5. single lane-dense output slab: CLS in lanes [0,H), ids bitcast in [H,H+S) ----
    cls = x[:, 0, :]                                                  # (bb, H)
    ids_bits = pltpu.bitcast(ids, jnp.float32)                        # (bb, S), raw int32 bits
    pad = jnp.zeros((bb, 128 - H - S), jnp.float32)
    out_ref[...] = jnp.concatenate([cls, ids_bits, pad], axis=-1).reshape(bb, 1, 128)


# ----------------------------- pallas_call wrapper --------------------------------
def _num_batch_blocks():
    """v7x has 2 TensorCores/chip: split the batch across a parallel grid axis there.
    On v5e/v6e (single TC) keep one grid step (extra steps are pure overhead)."""
    try:
        kind = jax.devices()[0].device_kind.lower()
    except Exception:
        return 1
    return B if "v7" in kind else 1


@partial(jax.jit, static_argnames=("nb",))
def cxr_bert_feature_extractor(inputs, w_packed, nb=1):
    """inputs: (B, S, V) float32 logits -> (cls_embeddings (B, H), token_ids (B, S) int32)."""
    bb = B // nb
    out = pl.pallas_call(
        fused_kernel,
        out_shape=jax.ShapeDtypeStruct((B, 1, 128), jnp.float32),
        grid=(nb,),
        in_specs=[pl.BlockSpec((bb, S, V), lambda i: (i, 0, 0)),
                  pl.BlockSpec((W_ROWS, 128), lambda i: (0, 0))],
        out_specs=pl.BlockSpec((bb, 1, 128), lambda i: (i, 0, 0)),
        compiler_params=pltpu.CompilerParams(
            dimension_semantics=("parallel",)),
    )(inputs, w_packed)
    cls_embeddings = out[:, 0, :H]                                        # (B, H)
    token_ids = jax.lax.bitcast_convert_type(out[:, 0, H:H + S], jnp.int32)  # (B, S)
    return cls_embeddings, token_ids


# ----------------------------- parameter init & packing ---------------------------
def init_params(key):
    keys = jax.random.split(key, 8)
    scale = 0.02
    return {
        'tok_emb': scale * jax.random.normal(keys[0], (V, H), jnp.float32),
        'pos_emb': scale * jax.random.normal(keys[1], (S, H), jnp.float32),
        'ln_e_g': jnp.ones((H,), jnp.float32), 'ln_e_b': jnp.zeros((H,), jnp.float32),
        'wq': scale * jax.random.normal(keys[2], (H, H), jnp.float32),
        'bq': jnp.zeros((H,), jnp.float32),
        'wk': scale * jax.random.normal(keys[3], (H, H), jnp.float32),
        'bk': jnp.zeros((H,), jnp.float32),
        'wv': scale * jax.random.normal(keys[4], (H, H), jnp.float32),
        'bv': jnp.zeros((H,), jnp.float32),
        'wo': scale * jax.random.normal(keys[5], (H, H), jnp.float32),
        'bo': jnp.zeros((H,), jnp.float32),
        'ln1_g': jnp.ones((H,), jnp.float32), 'ln1_b': jnp.zeros((H,), jnp.float32),
        'w1': scale * jax.random.normal(keys[6], (H, FF), jnp.float32),
        'b1': jnp.zeros((FF,), jnp.float32),
        'w2': scale * jax.random.normal(keys[7], (FF, H), jnp.float32),
        'b2': jnp.zeros((H,), jnp.float32),
        'ln2_g': jnp.ones((H,), jnp.float32), 'ln2_b': jnp.zeros((H,), jnp.float32),
    }


def pack_weights(p):
    """Pack every parameter into one lane-dense (W_ROWS, 128) f32 slab (host-side, once).
    The 1/sqrt(HD) attention scale is folded into wq AND bq here (q_scaled = scale * q)."""
    attn_scale = 1.0 / float(HD) ** 0.5
    w = jnp.zeros((W_ROWS, 128), jnp.float32)
    w = w.at[ROW_WATTN:ROW_WATTN + H, 0 * H:1 * H].set(p['wq'] * attn_scale)
    w = w.at[ROW_WATTN:ROW_WATTN + H, 1 * H:2 * H].set(p['wk'])
    w = w.at[ROW_WATTN:ROW_WATTN + H, 2 * H:3 * H].set(p['wv'])
    w = w.at[ROW_WATTN:ROW_WATTN + H, 3 * H:4 * H].set(p['wo'])
    w = w.at[ROW_W1:ROW_W1 + H, :FF].set(p['w1'])
    w = w.at[ROW_W2:ROW_W2 + FF, :H].set(p['w2'])
    w = w.at[ROW_TOKE:ROW_TOKE + V, :H].set(p['tok_emb'])
    w = w.at[ROW_POSE:ROW_POSE + S, :H].set(p['pos_emb'])
    vec_rows = [('bq', H, attn_scale), ('bk', H, 1.0), ('bv', H, 1.0), ('bo', H, 1.0),
                ('b1', FF, 1.0), ('b2', H, 1.0),
                ('ln_e_g', H, 1.0), ('ln_e_b', H, 1.0), ('ln1_g', H, 1.0), ('ln1_b', H, 1.0),
                ('ln2_g', H, 1.0), ('ln2_b', H, 1.0)]
    assert len(vec_rows) == N_VEC
    for r, (name, n, sc) in enumerate(vec_rows):
        w = w.at[ROW_VEC + r, :n].set(p[name] * sc)
    return w


# ----------------------------- main ------------------------------------------------
if __name__ == "__main__":
    key = jax.random.PRNGKey(0)
    k_in, k_par = jax.random.split(key)
    inputs = jax.random.normal(k_in, (B, S, V), jnp.float32)   # (2, 8, 32) "text probs"
    params = init_params(k_par)
    w_packed = pack_weights(params)                            # (184, 128) f32

    nb = _num_batch_blocks()                                   # 2 on v7x, else 1
    cls_emb, tok_ids = cxr_bert_feature_extractor(inputs, w_packed, nb=nb)
    jax.block_until_ready((cls_emb, tok_ids))

    assert cls_emb.shape == (B, H) and cls_emb.dtype == jnp.float32
    assert tok_ids.shape == (B, S) and tok_ids.dtype == jnp.int32
    assert bool(jnp.all(tok_ids == jnp.argmax(inputs, axis=-1).astype(jnp.int32)))
    assert bool(jnp.all(jnp.isfinite(cls_emb)))
    print("KERNEL_OK")
</pallas_src>

<mosaic_0001>
module attributes {stable_mosaic.version = 11 : i64} {
  func.func @fused_kernel(%arg0: i32, %arg1: memref<2x8x32xf32, #tpu.memory_space<vmem>>, %arg2: memref<184x128xf32, #tpu.memory_space<vmem>>, %arg3: memref<2x1x128xf32, #tpu.memory_space<vmem>>) attributes {dimension_semantics = [#tpu.dimension_semantics<parallel>], iteration_bounds = array<i64: 1>, scalar_prefetch = 0 : i64, scratch_operands = 0 : i64, tpu.core_type = #tpu.core_type<tc>, window_params = [{transform_indices = @transform_0, window_bounds = array<i64: 2, 8, 32>}, {pipeline_mode = #tpu.pipeline_mode<synchronous>, transform_indices = @transform_1, window_bounds = array<i64: 184, 128>}, {transform_indices = @transform_2, window_bounds = array<i64: 2, 1, 128>}]} {
    %c0 = arith.constant 0 : index
    %c0_0 = arith.constant 0 : index
    %c0_1 = arith.constant 0 : index
    %0 = vector.load %arg1[%c0, %c0_0, %c0_1] : memref<2x8x32xf32, #tpu.memory_space<vmem>>, vector<2x8x32xf32>
    %1 = tpu.iota {dimensions = array<i32: 2>} : vector<2x8x32xi32>
    %cst = arith.constant dense<0xFF800000> : vector<2x8xf32>
    %2 = vector.multi_reduction <maximumf>, %0, %cst [2] : vector<2x8x32xf32> to vector<2x8xf32>
    %3 = vector.shape_cast %2 : vector<2x8xf32> to vector<2x8x1xf32>
    %4 = vector.broadcast %3 : vector<2x8x1xf32> to vector<2x8x32xf32>
    %5 = arith.cmpf oeq, %0, %4 : vector<2x8x32xf32>
    %c32_i32 = arith.constant 32 : i32
    %6 = vector.broadcast %c32_i32 : i32 to vector<2x8x32xi32>
    %7 = arith.select %5, %1, %6 : vector<2x8x32xi1>, vector<2x8x32xi32>
    %cst_2 = arith.constant dense<2147483647> : vector<2x8xi32>
    %8 = vector.multi_reduction <minsi>, %7, %cst_2 [2] : vector<2x8x32xi32> to vector<2x8xi32>
    %c0_3 = arith.constant 0 : index
    %c0_4 = arith.constant 0 : index
    %9 = vector.load %arg2[%c0_3, %c0_4] : memref<184x128xf32, #tpu.memory_space<vmem>>, vector<32x128xf32>
    %c32 = arith.constant 32 : index
    %c0_5 = arith.constant 0 : index
    %10 = vector.load %arg2[%c32, %c0_5] : memref<184x128xf32, #tpu.memory_space<vmem>>, vector<32x64xf32>
    %c64 = arith.constant 64 : index
    %c0_6 = arith.constant 0 : index
    %11 = vector.load %arg2[%c64, %c0_6] : memref<184x128xf32, #tpu.memory_space<vmem>>, vector<64x32xf32>
    %c128 = arith.constant 128 : index
    %c0_7 = arith.constant 0 : index
    %12 = vector.load %arg2[%c128, %c0_7] : memref<184x128xf32, #tpu.memory_space<vmem>>, vector<32x32xf32>
    %c160 = arith.constant 160 : index
    %c0_8 = arith.constant 0 : index
    %13 = vector.load %arg2[%c160, %c0_8] : memref<184x128xf32, #tpu.memory_space<vmem>>, vector<8x32xf32>
    %c168 = arith.constant 168 : index
    %c0_9 = arith.constant 0 : index
    %14 = vector.load %arg2[%c168, %c0_9] : memref<184x128xf32, #tpu.memory_space<vmem>>, vector<16x128xf32>
    %15 = vector.extract_strided_slice %14 {offsets = [0, 0], sizes = [1, 32], strides = [1, 1]} : vector<16x128xf32> to vector<1x32xf32>
    %16 = vector.extract_strided_slice %14 {offsets = [1, 0], sizes = [1, 32], strides = [1, 1]} : vector<16x128xf32> to vector<1x32xf32>
    %17 = vector.extract_strided_slice %14 {offsets = [2, 0], sizes = [1, 32], strides = [1, 1]} : vector<16x128xf32> to vector<1x32xf32>
    %18 = vector.extract_strided_slice %14 {offsets = [3, 0], sizes = [1, 32], strides = [1, 1]} : vector<16x128xf32> to vector<1x32xf32>
    %19 = vector.extract_strided_slice %14 {offsets = [4, 0], sizes = [1, 64], strides = [1, 1]} : vector<16x128xf32> to vector<1x64xf32>
    %20 = vector.extract_strided_slice %14 {offsets = [5, 0], sizes = [1, 32], strides = [1, 1]} : vector<16x128xf32> to vector<1x32xf32>
    %21 = vector.extract_strided_slice %14 {offsets = [6, 0], sizes = [1, 32], strides = [1, 1]} : vector<16x128xf32> to vector<1x32xf32>
    %22 = vector.extract_strided_slice %14 {offsets = [7, 0], sizes = [1, 32], strides = [1, 1]} : vector<16x128xf32> to vector<1x32xf32>
    %23 = vector.extract_strided_slice %14 {offsets = [8, 0], sizes = [1, 32], strides = [1, 1]} : vector<16x128xf32> to vector<1x32xf32>
    %24 = vector.extract_strided_slice %14 {offsets = [9, 0], sizes = [1, 32], strides = [1, 1]} : vector<16x128xf32> to vector<1x32xf32>
    %25 = vector.extract_strided_slice %14 {offsets = [10, 0], sizes = [1, 32], strides = [1, 1]} : vector<16x128xf32> to vector<1x32xf32>
    %26 = vector.extract_strided_slice %14 {offsets = [11, 0], sizes = [1, 32], strides = [1, 1]} : vector<16x128xf32> to vector<1x32xf32>
    %27 = vector.shape_cast %8 : vector<2x8xi32> to vector<2x8x1xi32>
    %28 = vector.broadcast %27 : vector<2x8x1xi32> to vector<2x8x32xi32>
    %29 = arith.cmpi eq, %1, %28 : vector<2x8x32xi32>
    %30 = arith.extui %29 : vector<2x8x32xi1> to vector<2x8x32xi32>
    %31 = arith.sitofp %30 : vector<2x8x32xi32> to vector<2x8x32xf32>
    "tpu.trace_start"() <{level = 10 : i32, message = "bsv,vh->bsh"}> : () -> ()
    %cst_10 = arith.constant dense<0.000000e+00> : vector<2x8x32xf32>
    %32 = tpu.matmul %31, %12, %cst_10 {dimension_numbers = #tpu.dot_dimension_numbers<[2], [0], [0, 1], [1], [0, 0, 0, 1, 1, 1], [], []>} : vector<2x8x32xf32>, vector<32x32xf32>, vector<2x8x32xf32> -> vector<2x8x32xf32>
    "tpu.trace_stop"() : () -> ()
    %33 = vector.shape_cast %13 : vector<8x32xf32> to vector<1x8x32xf32>
    %34 = vector.broadcast %33 : vector<1x8x32xf32> to vector<2x8x32xf32>
    %35 = arith.addf %32, %34 : vector<2x8x32xf32>
    %cst_11 = arith.constant dense<0.000000e+00> : vector<2x8xf32>
    %36 = vector.multi_reduction <add>, %35, %cst_11 [2] : vector<2x8x32xf32> to vector<2x8xf32>
    %37 = vector.shape_cast %36 : vector<2x8xf32> to vector<2x8x1xf32>
    %cst_12 = arith.constant 3.200000e+01 : f32
    %38 = vector.broadcast %cst_12 : f32 to vector<2x8x1xf32>
    %39 = arith.divf %37, %38 : vector<2x8x1xf32>
    %40 = vector.broadcast %39 : vector<2x8x1xf32> to vector<2x8x32xf32>
    %41 = arith.subf %35, %40 : vector<2x8x32xf32>
    %42 = arith.mulf %41, %41 : vector<2x8x32xf32>
    %cst_13 = arith.constant dense<0.000000e+00> : vector<2x8xf32>
    %43 = vector.multi_reduction <add>, %42, %cst_13 [2] : vector<2x8x32xf32> to vector<2x8xf32>
    %44 = vector.shape_cast %43 : vector<2x8xf32> to vector<2x8x1xf32>
    %cst_14 = arith.constant 3.200000e+01 : f32
    %45 = vector.broadcast %cst_14 : f32 to vector<2x8x1xf32>
    %46 = arith.divf %44, %45 : vector<2x8x1xf32>
    %47 = vector.broadcast %39 : vector<2x8x1xf32> to vector<2x8x32xf32>
    %48 = arith.subf %35, %47 : vector<2x8x32xf32>
    %cst_15 = arith.constant 9.99999996E-13 : f32
    %49 = vector.broadcast %cst_15 : f32 to vector<2x8x1xf32>
    %50 = arith.addf %46, %49 : vector<2x8x1xf32>
    %51 = math.rsqrt %50 : vector<2x8x1xf32>
    %52 = vector.broadcast %51 : vector<2x8x1xf32> to vector<2x8x32xf32>
    %53 = arith.mulf %48, %52 : vector<2x8x32xf32>
    %54 = vector.shape_cast %21 : vector<1x32xf32> to vector<1x1x32xf32>
    %55 = vector.broadcast %54 : vector<1x1x32xf32> to vector<2x8x32xf32>
    %56 = arith.mulf %53, %55 : vector<2x8x32xf32>
    %57 = vector.shape_cast %22 : vector<1x32xf32> to vector<1x1x32xf32>
    %58 = vector.broadcast %57 : vector<1x1x32xf32> to vector<2x8x32xf32>
    %59 = arith.addf %56, %58 : vector<2x8x32xf32>
    "tpu.trace_start"() <{level = 10 : i32, message = "bsh,hd->bsd"}> : () -> ()
    %cst_16 = arith.constant dense<0.000000e+00> : vector<2x8x128xf32>
    %60 = tpu.matmul %59, %9, %cst_16 {dimension_numbers = #tpu.dot_dimension_numbers<[2], [0], [0, 1], [1], [0, 0, 0, 1, 1, 1], [], []>} : vector<2x8x32xf32>, vector<32x128xf32>, vector<2x8x128xf32> -> vector<2x8x128xf32>
    "tpu.trace_stop"() : () -> ()
    %61 = vector.extract_strided_slice %60 {offsets = [0, 0, 0], sizes = [2, 8, 32], strides = [1, 1, 1]} : vector<2x8x128xf32> to vector<2x8x32xf32>
    %62 = vector.shape_cast %15 : vector<1x32xf32> to vector<1x1x32xf32>
    %63 = vector.broadcast %62 : vector<1x1x32xf32> to vector<2x8x32xf32>
    %64 = arith.addf %61, %63 : vector<2x8x32xf32>
    %65 = vector.extract_strided_slice %60 {offsets = [0, 0, 32], sizes = [2, 8, 32], strides = [1, 1, 1]} : vector<2x8x128xf32> to vector<2x8x32xf32>
    %66 = vector.shape_cast %16 : vector<1x32xf32> to vector<1x1x32xf32>
    %67 = vector.broadcast %66 : vector<1x1x32xf32> to vector<2x8x32xf32>
    %68 = arith.addf %65, %67 : vector<2x8x32xf32>
    %69 = vector.extract_strided_slice %60 {offsets = [0, 0, 64], sizes = [2, 8, 32], strides = [1, 1, 1]} : vector<2x8x128xf32> to vector<2x8x32xf32>
    %70 = vector.shape_cast %17 : vector<1x32xf32> to vector<1x1x32xf32>
    %71 = vector.broadcast %70 : vector<1x1x32xf32> to vector<2x8x32xf32>
    %72 = arith.addf %69, %71 : vector<2x8x32xf32>
    %73 = vector.extract_strided_slice %9 {offsets = [0, 96], sizes = [32, 32], strides = [1, 1]} : vector<32x128xf32> to vector<32x32xf32>
    %74 = vector.extract_strided_slice %64 {offsets = [0, 0, 0], sizes = [2, 8, 8], strides = [1, 1, 1]} : vector<2x8x32xf32> to vector<2x8x8xf32>
    %75 = vector.extract_strided_slice %64 {offsets = [0, 0, 8], sizes = [2, 8, 8], strides = [1, 1, 1]} : vector<2x8x32xf32> to vector<2x8x8xf32>
    %76 = vector.extract_strided_slice %64 {offsets = [0, 0, 16], sizes = [2, 8, 8], strides = [1, 1, 1]} : vector<2x8x32xf32> to vector<2x8x8xf32>
    %77 = vector.extract_strided_slice %64 {offsets = [0, 0, 24], sizes = [2, 8, 8], strides = [1, 1, 1]} : vector<2x8x32xf32> to vector<2x8x8xf32>
    %78 = tpu.concatenate %74, %75, %76, %77 in 0 : vector<2x8x8xf32>, vector<2x8x8xf32>, vector<2x8x8xf32>, vector<2x8x8xf32> -> vector<8x8x8xf32>
    %79 = vector.extract_strided_slice %68 {offsets = [0, 0, 0], sizes = [2, 8, 8], strides = [1, 1, 1]} : vector<2x8x32xf32> to vector<2x8x8xf32>
    %80 = vector.extract_strided_slice %68 {offsets = [0, 0, 8], sizes = [2, 8, 8], strides = [1, 1, 1]} : vector<2x8x32xf32> to vector<2x8x8xf32>
    %81 = vector.extract_strided_slice %68 {offsets = [0, 0, 16], sizes = [2, 8, 8], strides = [1, 1, 1]} : vector<2x8x32xf32> to vector<2x8x8xf32>
    %82 = vector.extract_strided_slice %68 {offsets = [0, 0, 24], sizes = [2, 8, 8], strides = [1, 1, 1]} : vector<2x8x32xf32> to vector<2x8x8xf32>
    %83 = tpu.concatenate %79, %80, %81, %82 in 0 : vector<2x8x8xf32>, vector<2x8x8xf32>, vector<2x8x8xf32>, vector<2x8x8xf32> -> vector<8x8x8xf32>
    %84 = vector.extract_strided_slice %72 {offsets = [0, 0, 0], sizes = [2, 8, 8], strides = [1, 1, 1]} : vector<2x8x32xf32> to vector<2x8x8xf32>
    %85 = vector.extract_strided_slice %72 {offsets = [0, 0, 8], sizes = [2, 8, 8], strides = [1, 1, 1]} : vector<2x8x32xf32> to vector<2x8x8xf32>
    %86 = vector.extract_strided_slice %72 {offsets = [0, 0, 16], sizes = [2, 8, 8], strides = [1, 1, 1]} : vector<2x8x32xf32> to vector<2x8x8xf32>
    %87 = vector.extract_strided_slice %72 {offsets = [0, 0, 24], sizes = [2, 8, 8], strides = [1, 1, 1]} : vector<2x8x32xf32> to vector<2x8x8xf32>
    %88 = tpu.concatenate %84, %85, %86, %87 in 0 : vector<2x8x8xf32>, vector<2x8x8xf32>, vector<2x8x8xf32>, vector<2x8x8xf32> -> vector<8x8x8xf32>
    "tpu.trace_start"() <{level = 10 : i32, message = "bqd,bkd->bqk"}> : () -> ()
    %cst_17 = arith.constant dense<0.000000e+00> : vector<8x8x8xf32>
    %89 = tpu.matmul %78, %83, %cst_17 {dimension_numbers = #tpu.dot_dimension_numbers<[2], [2], [1], [1], [0, 0, 0, 1, 1, 1], [0], [0]>} : vector<8x8x8xf32>, vector<8x8x8xf32>, vector<8x8x8xf32> -> vector<8x8x8xf32>
    "tpu.trace_stop"() : () -> ()
    %cst_18 = arith.constant dense<0xFF800000> : vector<8x8xf32>
    %90 = vector.multi_reduction <maximumf>, %89, %cst_18 [2] : vector<8x8x8xf32> to vector<8x8xf32>
    %91 = vector.shape_cast %90 : vector<8x8xf32> to vector<8x8x1xf32>
    %92 = vector.broadcast %91 : vector<8x8x1xf32> to vector<8x8x8xf32>
    %93 = arith.subf %89, %92 : vector<8x8x8xf32>
    %94 = math.exp %93 : vector<8x8x8xf32>
    %cst_19 = arith.constant dense<0.000000e+00> : vector<8x8xf32>
    %95 = vector.multi_reduction <add>, %94, %cst_19 [2] : vector<8x8x8xf32> to vector<8x8xf32>
    %96 = vector.shape_cast %95 : vector<8x8xf32> to vector<8x8x1xf32>
    %97 = tpu.reciprocal %96 {approx = true} : vector<8x8x1xf32> -> vector<8x8x1xf32>
    %98 = vector.broadcast %97 : vector<8x8x1xf32> to vector<8x8x8xf32>
    %99 = arith.mulf %94, %98 : vector<8x8x8xf32>
    "tpu.trace_start"() <{level = 10 : i32, message = "bqk,bkd->bqd"}> : () -> ()
    %cst_20 = arith.constant dense<0.000000e+00> : vector<8x8x8xf32>
    %100 = tpu.matmul %99, %88, %cst_20 {dimension_numbers = #tpu.dot_dimension_numbers<[2], [1], [1], [2], [0, 0, 0, 1, 1, 2], [0], [0]>} : vector<8x8x8xf32>, vector<8x8x8xf32>, vector<8x8x8xf32> -> vector<8x8x8xf32>
    "tpu.trace_stop"() : () -> ()
    %101 = vector.extract_strided_slice %100 {offsets = [0, 0, 0], sizes = [2, 8, 8], strides = [1, 1, 1]} : vector<8x8x8xf32> to vector<2x8x8xf32>
    %102 = vector.extract_strided_slice %100 {offsets = [2, 0, 0], sizes = [2, 8, 8], strides = [1, 1, 1]} : vector<8x8x8xf32> to vector<2x8x8xf32>
    %103 = vector.extract_strided_slice %100 {offsets = [4, 0, 0], sizes = [2, 8, 8], strides = [1, 1, 1]} : vector<8x8x8xf32> to vector<2x8x8xf32>
    %104 = vector.extract_strided_slice %100 {offsets = [6, 0, 0], sizes = [2, 8, 8], strides = [1, 1, 1]} : vector<8x8x8xf32> to vector<2x8x8xf32>
    %105 = tpu.concatenate %101, %102, %103, %104 in 2 : vector<2x8x8xf32>, vector<2x8x8xf32>, vector<2x8x8xf32>, vector<2x8x8xf32> -> vector<2x8x32xf32>
    "tpu.trace_start"() <{level = 10 : i32, message = "bsh,hk->bsk"}> : () -> ()
    %cst_21 = arith.constant dense<0.000000e+00> : vector<2x8x32xf32>
    %106 = tpu.matmul %105, %73, %cst_21 {dimension_numbers = #tpu.dot_dimension_numbers<[2], [0], [0, 1], [1], [0, 0, 0, 1, 1, 1], [], []>} : vector<2x8x32xf32>, vector<32x32xf32>, vector<2x8x32xf32> -> vector<2x8x32xf32>
    "tpu.trace_stop"() : () -> ()
    %107 = vector.shape_cast %18 : vector<1x32xf32> to vector<1x1x32xf32>
    %108 = vector.broadcast %107 : vector<1x1x32xf32> to vector<2x8x32xf32>
    %109 = arith.addf %106, %108 : vector<2x8x32xf32>
    %110 = arith.addf %59, %109 : vector<2x8x32xf32>
    %cst_22 = arith.constant dense<0.000000e+00> : vector<2x8xf32>
    %111 = vector.multi_reduction <add>, %110, %cst_22 [2] : vector<2x8x32xf32> to vector<2x8xf32>
    %112 = vector.shape_cast %111 : vector<2x8xf32> to vector<2x8x1xf32>
    %cst_23 = arith.constant 3.200000e+01 : f32
    %113 = vector.broadcast %cst_23 : f32 to vector<2x8x1xf32>
    %114 = arith.divf %112, %113 : vector<2x8x1xf32>
    %115 = vector.broadcast %114 : vector<2x8x1xf32> to vector<2x8x32xf32>
    %116 = arith.subf %110, %115 : vector<2x8x32xf32>
    %117 = arith.mulf %116, %116 : vector<2x8x32xf32>
    %cst_24 = arith.constant dense<0.000000e+00> : vector<2x8xf32>
    %118 = vector.multi_reduction <add>, %117, %cst_24 [2] : vector<2x8x32xf32> to vector<2x8xf32>
    %119 = vector.shape_cast %118 : vector<2x8xf32> to vector<2x8x1xf32>
    %cst_25 = arith.constant 3.200000e+01 : f32
    %120 = vector.broadcast %cst_25 : f32 to vector<2x8x1xf32>
    %121 = arith.divf %119, %120 : vector<2x8x1xf32>
    %122 = vector.broadcast %114 : vector<2x8x1xf32> to vector<2x8x32xf32>
    %123 = arith.subf %110, %122 : vector<2x8x32xf32>
    %cst_26 = arith.constant 9.99999996E-13 : f32
    %124 = vector.broadcast %cst_26 : f32 to vector<2x8x1xf32>
    %125 = arith.addf %121, %124 : vector<2x8x1xf32>
    %126 = math.rsqrt %125 : vector<2x8x1xf32>
    %127 = vector.broadcast %126 : vector<2x8x1xf32> to vector<2x8x32xf32>
    %128 = arith.mulf %123, %127 : vector<2x8x32xf32>
    %129 = vector.shape_cast %23 : vector<1x32xf32> to vector<1x1x32xf32>
    %130 = vector.broadcast %129 : vector<1x1x32xf32> to vector<2x8x32xf32>
    %131 = arith.mulf %128, %130 : vector<2x8x32xf32>
    %132 = vector.shape_cast %24 : vector<1x32xf32> to vector<1x1x32xf32>
    %133 = vector.broadcast %132 : vector<1x1x32xf32> to vector<2x8x32xf32>
    %134 = arith.addf %131, %133 : vector<2x8x32xf32>
    "tpu.trace_start"() <{level = 10 : i32, message = "bsh,hf->bsf"}> : () -> ()
    %cst_27 = arith.constant dense<0.000000e+00> : vector<2x8x64xf32>
    %135 = tpu.matmul %134, %10, %cst_27 {dimension_numbers = #tpu.dot_dimension_numbers<[2], [0], [0, 1], [1], [0, 0, 0, 1, 1, 1], [], []>} : vector<2x8x32xf32>, vector<32x64xf32>, vector<2x8x64xf32> -> vector<2x8x64xf32>
    "tpu.trace_stop"() : () -> ()
    %136 = vector.shape_cast %19 : vector<1x64xf32> to vector<1x1x64xf32>
    %137 = vector.broadcast %136 : vector<1x1x64xf32> to vector<2x8x64xf32>
    %138 = arith.addf %135, %137 : vector<2x8x64xf32>
    %139 = arith.mulf %138, %138 : vector<2x8x64xf32>
    %140 = arith.mulf %138, %139 : vector<2x8x64xf32>
    %cst_28 = arith.constant 4.471500e-02 : f32
    %141 = vector.broadcast %cst_28 : f32 to vector<2x8x64xf32>
    %142 = arith.mulf %141, %140 : vector<2x8x64xf32>
    %143 = arith.addf %138, %142 : vector<2x8x64xf32>
    %cst_29 = arith.constant 0.797884583 : f32
    %144 = vector.broadcast %cst_29 : f32 to vector<2x8x64xf32>
    %145 = arith.mulf %144, %143 : vector<2x8x64xf32>
    %146 = math.tanh %145 : vector<2x8x64xf32>
    %cst_30 = arith.constant 1.000000e+00 : f32
    %147 = vector.broadcast %cst_30 : f32 to vector<2x8x64xf32>
    %148 = arith.addf %147, %146 : vector<2x8x64xf32>
    %cst_31 = arith.constant 5.000000e-01 : f32
    %149 = vector.broadcast %cst_31 : f32 to vector<2x8x64xf32>
    %150 = arith.mulf %149, %148 : vector<2x8x64xf32>
    %151 = arith.mulf %138, %150 : vector<2x8x64xf32>
    "tpu.trace_start"() <{level = 10 : i32, message = "bsf,fh->bsh"}> : () -> ()
    %cst_32 = arith.constant dense<0.000000e+00> : vector<2x8x32xf32>
    %152 = tpu.matmul %151, %11, %cst_32 {dimension_numbers = #tpu.dot_dimension_numbers<[2], [0], [0, 1], [1], [0, 0, 0, 1, 1, 1], [], []>} : vector<2x8x64xf32>, vector<64x32xf32>, vector<2x8x32xf32> -> vector<2x8x32xf32>
    "tpu.trace_stop"() : () -> ()
    %153 = vector.shape_cast %20 : vector<1x32xf32> to vector<1x1x32xf32>
    %154 = vector.broadcast %153 : vector<1x1x32xf32> to vector<2x8x32xf32>
    %155 = arith.addf %152, %154 : vector<2x8x32xf32>
    %156 = arith.addf %134, %155 : vector<2x8x32xf32>
    %cst_33 = arith.constant dense<0.000000e+00> : vector<2x8xf32>
    %157 = vector.multi_reduction <add>, %156, %cst_33 [2] : vector<2x8x32xf32> to vector<2x8xf32>
    %158 = vector.shape_cast %157 : vector<2x8xf32> to vector<2x8x1xf32>
    %cst_34 = arith.constant 3.200000e+01 : f32
    %159 = vector.broadcast %cst_34 : f32 to vector<2x8x1xf32>
    %160 = arith.divf %158, %159 : vector<2x8x1xf32>
    %161 = vector.broadcast %160 : vector<2x8x1xf32> to vector<2x8x32xf32>
    %162 = arith.subf %156, %161 : vector<2x8x32xf32>
    %163 = arith.mulf %162, %162 : vector<2x8x32xf32>
    %cst_35 = arith.constant dense<0.000000e+00> : vector<2x8xf32>
    %164 = vector.multi_reduction <add>, %163, %cst_35 [2] : vector<2x8x32xf32> to vector<2x8xf32>
    %165 = vector.shape_cast %164 : vector<2x8xf32> to vector<2x8x1xf32>
    %cst_36 = arith.constant 3.200000e+01 : f32
    %166 = vector.broadcast %cst_36 : f32 to vector<2x8x1xf32>
    %167 = arith.divf %165, %166 : vector<2x8x1xf32>
    %168 = vector.broadcast %160 : vector<2x8x1xf32> to vector<2x8x32xf32>
    %169 = arith.subf %156, %168 : vector<2x8x32xf32>
    %cst_37 = arith.constant 9.99999996E-13 : f32
    %170 = vector.broadcast %cst_37 : f32 to vector<2x8x1xf32>
    %171 = arith.addf %167, %170 : vector<2x8x1xf32>
    %172 = math.rsqrt %171 : vector<2x8x1xf32>
    %173 = vector.broadcast %172 : vector<2x8x1xf32> to vector<2x8x32xf32>
    %174 = arith.mulf %169, %173 : vector<2x8x32xf32>
    %175 = vector.shape_cast %25 : vector<1x32xf32> to vector<1x1x32xf32>
    %176 = vector.broadcast %175 : vector<1x1x32xf32> to vector<2x8x32xf32>
    %177 = arith.mulf %174, %176 : vector<2x8x32xf32>
    %178 = vector.shape_cast %26 : vector<1x32xf32> to vector<1x1x32xf32>
    %179 = vector.broadcast %178 : vector<1x1x32xf32> to vector<2x8x32xf32>
    %180 = arith.addf %177, %179 : vector<2x8x32xf32>
    %181 = vector.extract_strided_slice %180 {offsets = [0, 0, 0], sizes = [2, 1, 32], strides = [1, 1, 1]} : vector<2x8x32xf32> to vector<2x1x32xf32>
    %182 = vector.shape_cast %181 : vector<2x1x32xf32> to vector<2x32xf32>
    %183 = tpu.bitcast %8 : vector<2x8xi32> -> vector<2x8xf32>
    %cst_38 = arith.constant 0.000000e+00 : f32
    %184 = vector.broadcast %cst_38 : f32 to vector<2x88xf32>
    %185 = tpu.concatenate %182, %183, %184 in 1 : vector<2x32xf32>, vector<2x8xf32>, vector<2x88xf32> -> vector<2x128xf32>
    %186 = vector.shape_cast %185 : vector<2x128xf32> to vector<2x1x128xf32>
    %c0_39 = arith.constant 0 : index
    %c0_40 = arith.constant 0 : index
    %c0_41 = arith.constant 0 : index
    %187 = vector.load %arg3[%c0_39, %c0_40, %c0_41] : memref<2x1x128xf32, #tpu.memory_space<vmem>>, vector<2x1x128xf32>
    tpu.vector_store %arg3[%c0_39, %c0_40, %c0_41], %186 {strides = array<i32>} : memref<2x1x128xf32, #tpu.memory_space<vmem>>, vector<2x1x128xf32>,
    return
  }
  func.func @transform_0(%arg0: i32) -> (i32, i32, i32) {
    %c0_i32 = arith.constant 0 : i32
    %c0_i32_0 = arith.constant 0 : i32
    %c0_i32_1 = arith.constant 0 : i32
    return %arg0, %c0_i32, %c0_i32_0 : i32, i32, i32
  }
  func.func @transform_1(%arg0: i32) -> (i32, i32) {
    %c0_i32 = arith.constant 0 : i32
    %c0_i32_0 = arith.constant 0 : i32
    %c0_i32_1 = arith.constant 0 : i32
    return %c0_i32, %c0_i32_0 : i32, i32
  }
  func.func @transform_2(%arg0: i32) -> (i32, i32, i32) {
    %c0_i32 = arith.constant 0 : i32
    %c0_i32_0 = arith.constant 0 : i32
    %c0_i32_1 = arith.constant 0 : i32
    return %arg0, %c0_i32, %c0_i32_0 : i32, i32, i32
  }
}

</mosaic_0001>

<bundles_post_ra>
// kernel: cxr_bert_feature_extractor.1
= control target key start
LH: loop header
LB: loop body
LE: loop exit
PB: predicated region body
PF: predicated region fallthrough
CT: control target
= control target key end

     0   :  { %7 = vsyncpa [#allocation3], 0  ;;  %s2884_s0 = inlined_call_operand.hbm [shape: f32[2,8,32], index: 0, kind: input, shape index: {}]   ;;  %s2885_s1 = inlined_call_operand.hbm [shape: f32[184,128], index: 1, kind: input, shape index: {}]   ;;  %s2886_s2 = inlined_call_operand.vmem [shape: f32[2,1,128], index: 2, kind: output, shape index: {}]  }
   0x1   :  { %8 = vsyncpa [#allocation5], 0  ;;  %s2558_s9 = smov [#allocation2]   ;;  %s2510_s13 = scalar_lea.hbm %s2884_s0, 256 }
   0x2   :  { %s14_s10 = sshll.u32 %s2558_s9, 4  ;;  %p2511_p0 = scmp.ne.s32.totalorder %s2884_s0, %s2510_s13  ;;  %s15_s10 = int_to_ptr.vmem [resolvable:$true] %s14_s10 }
   0x3   :  { %p2514_p1 = scmp.lt.u32.totalorder %s2510_s13, %s2884_s0 }
   0x5   :  { %p2516_p2 = pnand %p2514_p1, %p2511_p0 }
   0x7   :  { %2519 = shalt.err (!%p2516_p2)
}
   0x8   :  { %s2520_s18 = scalar_lea.vmem %s15_s10, 256  ;;  %p2525_p4 = scmp.lt.s32.totalorder %s15_s10, %s15_s10 }
   0x9   :  { %p2521_p3 = scmp.ne.s32.totalorder %s15_s10, %s2520_s18  ;;  %p2526_p5 = scmp.lt.s32.totalorder %s2520_s18, %s2520_s18 }
   0xb   :  { %p2527_p6 = por %p2526_p5, %p2525_p4 }
   0xd   :  { %p2528_p7 = pnand %p2527_p6, %p2521_p3 }
   0xf   :  { %2531 = shalt.err (!%p2528_p7)
}
  0x10   :  { %s2559_s19 = smov 128   ;;  %s2560_s20 = smov 8  }
  0x11   :  { %20 = dma.hbm_to_vmem [thread:$0]  %s2884_s0, 256, %s15_s10, [#allocation3], %s2559_s19, %s2559_s19, %s2560_s20  }
  0x12   :  { %s2561_s23 = smov [#allocation4]   ;;  %s2532_s27 = scalar_lea.hbm %s2885_s1, 2944 }
  0x13   :  { %s26_s24 = sshll.u32 %s2561_s23, 4  ;;  %p2533_p8 = scmp.ne.s32.totalorder %s2885_s1, %s2532_s27  ;;  %s27_s24 = int_to_ptr.vmem [resolvable:$true] %s26_s24 }
  0x14   :  { %p2536_p9 = scmp.lt.u32.totalorder %s2532_s27, %s2885_s1 }
  0x16   :  { %p2538_p10 = pnand %p2536_p9, %p2533_p8 }
  0x18   :  { %2541 = shalt.err (!%p2538_p10)
}
  0x19   :  { %s2542_s4 = scalar_lea.vmem %s27_s24, 2944  ;;  %p2547_p12 = scmp.lt.s32.totalorder %s27_s24, %s27_s24 }
  0x1a   :  { %p2543_p11 = scmp.ne.s32.totalorder %s27_s24, %s2542_s4  ;;  %p2548_p13 = scmp.lt.s32.totalorder %s2542_s4, %s2542_s4 }
  0x1c   :  { %p2549_p0 = por %p2548_p13, %p2547_p12 }
  0x1e   :  { %p2550_p1 = pnand %p2549_p0, %p2543_p11 }
  0x20   :  { %2553 = shalt.err (!%p2550_p1)
}
  0x21   :  { %32 = dma.hbm_to_vmem [thread:$0]  %s2885_s1, 2944, %s27_s24, [#allocation5], %s2559_s19, %s2559_s19, %s2560_s20  }
  0x22   :  { %2554 = dma.done.wait [#allocation3], 256  }
  0x23   :  { %2555 = vsyncadd [#allocation3], 4294967040 }
  0x24   :  { %2556 = dma.done.wait [#allocation5], 2944  }
  0x25   :  { %2557 = vsyncadd [#allocation5], 4294964352  ;;  %vm43_vm0 = vcmask 261120   ;;  %v39_v0 = vld [vmem:[#allocation2] sm:$0xff]  ;;  %v40_v1 = vld [vmem:[#allocation2 + $0x8] sm:$0xff]  ;;  %v41_v4 = vlaneseq  ;;  %v2562_v30 = vmov 0.0  }
  0x26   :  { %v44_v2 = vsel %vm43_vm0, %v39_v0, -inf  ;;  %v47_v3 = vsel %vm43_vm0, %v40_v1, -inf  ;;  %v100_v24 = vld [vmem:[#allocation4 + $0x80] sm:$0xff]  ;;  %v101_v25 = vld [vmem:[#allocation4 + $0x88] sm:$0xff]  ;;  %v102_v27 = vld [vmem:[#allocation4 + $0x90] sm:$0xff]  ;;  %2268 = vmatprep.subr.mxu0 %v2562_v30  ;;  %vm2092_vm6 = vcmask 1041409  }
  0x27   :  { %45 = vmax.xlane.f32.xlu0 %v44_v2  ;;  %v42_v5 = vand.u32 127, %v41_v4  ;;  %v2389_v26 = vpack.c.bf16 %v101_v25, %v100_v24  ;;  %v103_v28 = vld [vmem:[#allocation4 + $0x98] sm:$0xff]  ;;  %v2619_v32 = vshrl.u32 %v41_v4, 7  ;;  %v104_v49 = vld [vmem:[#allocation4 + $0xa0] sm:$0xff]  ;;  %s2563_s1 = smov 32   ;;  %vm2564_vm8 = vmmov 0  }
  0x28   :  { %v2393_v29 = vpack.c.bf16 %v103_v28, %v102_v27  ;;  %v2633_v2 = vld [vmem:[#allocation4] sm:$0xff]  ;;  %2270 = vmatprep.mubr.msk.f32.mxu0 %vm2564_vm8, %v2562_v30  ;;  %s2565_s6 = smov 112   ;;  %s2566_s7 = smov 120   ;;  %vm384_vm9 = vcmask 64512   ;;  %vm1713_vm10 = vcmask 130048   ;;  %vm1716_vm11 = vcmask 195584  }
  0x29   :  { %2390 = vmatprep.subr.bf16.mxu1 %v2389_v26  ;;  %v2095_v36 = vadd.s32 4294967264, %v42_v5  ;;  %s2567_s8 = smov 104   ;;  %s2568_s9 = smov 96   ;;  %vm1967_vm12 = vcmask 523264   ;;  %vm2107_vm13 = vcmask 326656  }
  0x2a   :  { %2392 = vmatpush3.bf16.msra.mxu1 %v2389_v26  ;;  %s2569_s10 = smov 64   ;;  %s2570_s11 = smov 16  }
  0x2b   :  { %48 = vmax.xlane.f32.xlu0 %v47_v3  ;;  %2394 = vmatprep.subr.bf16.mxu1 %v2393_v29  ;;  %v2098_v41 = vsub.s32 %v2095_v36, %v2619_v32  ;;  %v2635_v3 = vld [vmem:[#allocation4 + $0x8] sm:$0xff]  ;;  %s2571_s12 = smov 24  }
  0x2c   :  { %v2397_v4 = vpack.c.bf16 %v2635_v3, %v2633_v2 }
  0x2e   :  { %2396 = vmatpush3.bf16.msra.mxu1 %v2393_v29 }
  0x2f   :  { %2398 = vmatprep.subr.bf16.mxu1 %v2397_v4 }
  0xb4   :  { %v46_v6 = vpop.xlane.xlu0 %45 }
  0xb5   :  { %vm50_vm1 = vcmp.eq.f32.partialorder %v39_v0, %v46_v6  ;;  %v2641_v6 = vld [vmem:[#allocation4 + $0x18] sm:$0xff] }
  0xb6   :  { %v52_v7 = vsel %vm50_vm1, %v42_v5, 32 }
  0xb7   :  { %v54_v8 = vsel %vm43_vm0, %v52_v7, 2147483647 }
  0xb8   :  { %v49_v9 = vpop.xlane.xlu0 %48  ;;  %v56_v10 = vshra.s32 %v54_v8, 16  ;;  %v55_v16 = vand.u32 65535, %v54_v8  ;;  %v322_v8 = vsub.s32 1, %v2619_v32 }
  0xb9   :  { %vm51_vm2 = vcmp.eq.f32.partialorder %v40_v1, %v49_v9  ;;  %v2647_v9 = vld [vmem:[#allocation4 + $0xa8] sm:$0xff] }
  0xba   :  { %v53_v11 = vsel %vm51_vm2, %v42_v5, 32  ;;  %v58_v12 = vcvt.s32.f32 %v56_v10  ;;  %v57_v18 = vcvt.s32.f32 %v55_v16  ;;  %v323_v10 = vrot.slane %v2647_v9, %v322_v8 }
  0xbb   :  { %v69_v13 = vsel %vm43_vm0, %v53_v11, 2147483647 }
  0xbc   :  { %59 = vmin.xlane.f32.xlu1 %v58_v12  ;;  %v71_v14 = vshra.s32 %v69_v13, 16  ;;  %v70_v19 = vand.u32 65535, %v69_v13 }
  0xbe   :  { %v73_v15 = vcvt.s32.f32 %v71_v14  ;;  %v72_v22 = vcvt.s32.f32 %v70_v19 }
  0xc0   :  { %74 = vmin.xlane.f32.xlu1 %v73_v15 }
 0x149   :  { %v60_v17 = vpop.xlane.xlu1 %59 }
 0x14a   :  { %vm61_vm3 = vcmp.eq.f32.partialorder %v58_v12, %v60_v17  ;;  %v66_v31 = vcvt.f32.s32 %v60_v17  ;;  %v223_v17 = vsub.s32 6, %v2619_v32 }
 0x14b   :  { %v62_v20 = vsel %vm61_vm3, %v57_v18, inf  ;;  %v229_v18 = vsub.s32 7, %v2619_v32 }
 0x14c   :  { %63 = vmin.xlane.f32.xlu0 %v62_v20  ;;  %v67_v34 = vshll.u32 %v66_v31, 16  ;;  %v224_v19 = vrot.slane %v2647_v9, %v223_v17 }
 0x14d   :  { %v75_v21 = vpop.xlane.xlu1 %74  ;;  %v230_v24 = vrot.slane %v2647_v9, %v229_v18 }
 0x14e   :  { %vm76_vm4 = vcmp.eq.f32.partialorder %v73_v15, %v75_v21  ;;  %v81_v35 = vcvt.f32.s32 %v75_v21 }
 0x14f   :  { %v77_v23 = vsel %vm76_vm4, %v72_v22, inf }
 0x150   :  { %78 = vmin.xlane.f32.xlu1 %v77_v23  ;;  %v82_v40 = vshll.u32 %v81_v35, 16  ;;  %v316_v35 = vsub.s32 0, %v2619_v32 }
 0x1d9   :  { %v64_v33 = vpop.xlane.xlu0 %63 }
 0x1da   :  { %v65_v37 = vcvt.f32.s32 %v64_v33 }
 0x1dc   :  { %v68_v38 = vadd.s32 %v67_v34, %v65_v37  ;;  %v317_v37 = vrot.slane %v2647_v9, %v316_v35 }
 0x1dd   :  { %v79_v39 = vpop.xlane.xlu1 %78 }
 0x1de   :  { %v80_v42 = vcvt.f32.s32 %v79_v39  ;;  %vm107_vm5 = vcmp.eq.s32.totalorder %v42_v5, %v68_v38  ;;  %v2099_v45 = vrot.slane %v68_v38, %v2098_v41 }
 0x1df   :  { %v2142_v43 = vsel %vm107_vm5, 1.0, %v2562_v30 }
 0x1e0   :  { %v83_v44 = vadd.s32 %v82_v40, %v80_v42  ;;  %2254 = vmatprep.mubr.msk.f32.mxu1 %vm43_vm0, %v2142_v43 }
 0x1e2   :  { %v2103_v46 = vrot.slane %v83_v44, %v2098_v41  ;;  %vm108_vm7 = vcmp.eq.s32.totalorder %v42_v5, %v83_v44  ;;  %v2639_v5 = vld [vmem:[#allocation4 + $0x10] sm:$0xff] }
 0x1e3   :  { %v2143_v47 = vsel %vm108_vm7, 1.0, %v2562_v30  ;;  %v2401_v7 = vpack.c.bf16 %v2641_v6, %v2639_v5 }
 0x1e4   :  { %v2626_v48 = vsel %vm2092_vm6, %v2103_v46, %v2099_v45  ;;  %2255 = vmatmul.mubr.msk.f32.vlgmr.msra.gmra.mrb[0].mxu1 %vm43_vm0, %v2143_v47  ;;  %v332_v47 = vsub.s32 2, %v2619_v32 }
 0x1e5   :  { %2400 = vmatpush3.bf16.msra.mxu1 %v2397_v4 }
 0x1e6   :  { %2402 = vmatprep.subr.bf16.mxu1 %v2401_v7 }
 0x1e9   :  { %2404 = vmatpush3.bf16.msra.mxu1 %v2401_v7 }
 0x1ea   :  { %2273 = vmatprep.subr.mxu1 %v2562_v30 }
 0x2b7   :  { %v2256_v50 = vpop.f32.mrb[0].mxu1 }
 0x2b8   :  { %v191_v51 = vadd.f32 %v2256_v50, %v104_v49  ;;  %v185_v52 = vpop.f32.mrb[1].mxu1  ;;  %v333_v50 = vrot.slane %v2647_v9, %v332_v47 }
 0x2b9   :  { %v186_v53 = vadd.f32 %v185_v52, %v104_v49 }
 0x2ba   :  { %v197_v54 = vsel %vm43_vm0, %v191_v51, 0.0 }
 0x2bb   :  { %198 = vadd.xlane.f32.xlu1 %v197_v54  ;;  %v194_v55 = vsel %vm43_vm0, %v186_v53, 0.0 }
 0x2bc   :  { %195 = vadd.xlane.f32.xlu0 %v194_v55 }
 0x348   :  { %v199_v56 = vpop.xlane.xlu1 %198 }
 0x349   :  { %v202_v57 = vmul.f32 0.03125, %v199_v56  ;;  %v196_v58 = vpop.xlane.xlu0 %195 }
 0x34a   :  { %v201_v59 = vmul.f32 0.03125, %v196_v58 }
 0x34b   :  { %v204_v60 = vsub.f32 %v191_v51, %v202_v57 }
 0x34c   :  { %v203_v61 = vsub.f32 %v186_v53, %v201_v59 }
 0x34d   :  { %v206_v62 = vmul.f32 %v204_v60, %v204_v60 }
 0x34e   :  { %v205_v63 = vmul.f32 %v203_v61, %v203_v61 }
 0x34f   :  { %v210_v0 = vsel %vm43_vm0, %v206_v62, 0.0 }
 0x350   :  { %211 = vadd.xlane.f32.xlu1 %v210_v0  ;;  %v207_v1 = vsel %vm43_vm0, %v205_v63, 0.0 }
 0x351   :  { %208 = vadd.xlane.f32.xlu0 %v207_v1 }
 0x367   :  { %325 = vrot.lane.b32.xlu0 %v323_v10, %s2563_s1 }
 0x3dd   :  { %v212_v11 = vpop.xlane.xlu1 %211 }
 0x3de   :  { %v214_v12 = vmul.f32 0.03125, %v212_v11  ;;  %v209_v13 = vpop.xlane.xlu0 %208 }
 0x3df   :  { %v213_v14 = vmul.f32 0.03125, %v209_v13 }
 0x3e0   :  { %v216_v15 = vadd.f32 1e-12, %v214_v12 }
 0x3e1   :  { %v215_v16 = vadd.f32 1e-12, %v213_v14 }
 0x3e2   :  { %2462 = vrsqrt.f32 %v216_v15  ;;  %v326_v29 = vpop.permute.xlu0 %325 }
 0x3e3   :  { %2464 = vrsqrt.f32 %v215_v16 }
 0x3ec   :  { %v2463_v20 = vpop.eup %2462 }
 0x3ed   :  { %v2465_v21 = vpop.eup %2464  ;;  %v220_v22 = vmul.f32 %v2463_v20, %v204_v60 }
 0x3ee   :  { %v219_v23 = vmul.f32 %v2465_v21, %v203_v61 }
 0x3ef   :  { %v226_v25 = vmul.f32 %v224_v19, %v220_v22 }
 0x3f0   :  { %v225_v26 = vmul.f32 %v224_v19, %v219_v23 }
 0x3f1   :  { %v2659_v28 = vadd.f32 %v230_v24, %v226_v25 }
 0x3f2   :  { %v2657_v27 = vadd.f32 %v230_v24, %v225_v26 }
 0x3f4   :  { %2265 = vmatprep.mubr.msk.f32.mxu1 %vm43_vm0, %v2657_v27 }
 0x3f5   :  { %2266 = vmatmul.mubr.msk.f32.vlgmr.msra.gmra.mrb[2].mxu1 %vm43_vm0, %v2659_v28 }
 0x3f6   :  { %2275 = vmatprep.mubr.msk.f32.mxu1 %vm2564_vm8, %v2562_v30 }
 0x4c8   :  { %v2665_v31 = vpop.f32.mrb[2].mxu1 }
 0x4c9   :  { %v329_v33 = vadd.f32 %v2665_v31, %v326_v29  ;;  %v2672_v34 = vpop.f32.mrb[3].mxu1  ;;  %v319_v38 = vadd.f32 %v2665_v31, %v317_v37 }
 0x4ca   :  { %v328_v36 = vadd.f32 %v326_v29, %v2672_v34  ;;  %v318_v39 = vadd.f32 %v317_v37, %v2672_v34 }
 0x4cb   :  { %362 = vrot.lane.b32.xlu0 %v329_v33, %s2565_s6  ;;  %358 = vrot.lane.b32.xlu1 %v329_v33, %s2566_s7 }
 0x4cf   :  { %366 = vrot.lane.b32.xlu0 %v329_v33, %s2567_s8  ;;  %356 = vrot.lane.b32.xlu1 %v328_v36, %s2566_s7 }
 0x4d3   :  { %459 = vrot.lane.b32.xlu0 %v329_v33, %s2568_s9  ;;  %360 = vrot.lane.b32.xlu1 %v328_v36, %s2565_s6 }
 0x4d7   :  { %344 = vrot.lane.b32.xlu0 %v319_v38, %s2566_s7  ;;  %364 = vrot.lane.b32.xlu1 %v328_v36, %s2567_s8 }
 0x4db   :  { %348 = vrot.lane.b32.xlu0 %v319_v38, %s2565_s6  ;;  %382 = vrot.lane.b32.xlu1 %v328_v36, %s2568_s9 }
 0x4df   :  { %342 = vrot.lane.b32.xlu1 %v318_v39, %s2566_s7 }
 0x4e3   :  { %346 = vrot.lane.b32.xlu1 %v318_v39, %s2565_s6 }
 0x53d   :  { %v363_v40 = vpop.permute.xlu0 %362  ;;  %v359_v41 = vpop.permute.xlu1 %358 }
 0x53e   :  { %611 = vrot.lane.b32.xlu0 %v359_v41, %s2568_s9 }
 0x541   :  { %v367_v42 = vpop.permute.xlu0 %366  ;;  %v357_v43 = vpop.permute.xlu1 %356 }
 0x542   :  { %763 = vrot.lane.b32.xlu0 %v363_v40, %s2568_s9  ;;  %535 = vrot.lane.b32.xlu1 %v357_v43, %s2568_s9 }
 0x545   :  { %v460_v44 = vpop.permute.xlu0 %459  ;;  %v361_v45 = vpop.permute.xlu1 %360 }
 0x546   :  { %2274 = vmatpush3.xpose.msk.msra.mxu1 %vm384_vm9, %v460_v44  ;;  %915 = vrot.lane.b32.xlu0 %v367_v42, %s2568_s9 }
 0x547   :  { %687 = vrot.lane.b32.xlu1 %v361_v45, %s2568_s9  ;;  %2283 = vmatprep.subr.mxu1 %v2562_v30 }
 0x549   :  { %2276 = vmatmul.mubr.msk.f32.vlgmr.msra.gmra.mrb[4].mxu1 %vm384_vm9, %v319_v38  ;;  %v365_v46 = vpop.permute.xlu1 %364  ;;  %v345_v51 = vpop.permute.xlu0 %344 }
 0x54a   :  { %352 = vrot.lane.b32.xlu0 %v319_v38, %s2567_s8  ;;  %2285 = vmatprep.mubr.msk.f32.mxu1 %vm2564_vm8, %v2562_v30 }
 0x54b   :  { %839 = vrot.lane.b32.xlu1 %v365_v46, %s2568_s9 }
 0x54d   :  { %v383_v49 = vpop.permute.xlu1 %382  ;;  %v349_v53 = vpop.permute.xlu0 %348 }
 0x54e   :  { %2269 = vmatpush3.xpose.msk.msra.mxu0 %vm384_vm9, %v383_v49 }
 0x54f   :  { %350 = vrot.lane.b32.xlu1 %v318_v39, %s2567_s8  ;;  %2278 = vmatprep.subr.mxu0 %v2562_v30 }
 0x551   :  { %2271 = vmatmul.mubr.msk.f32.vlgmr.msra.gmra.mrb[0].mxu0 %vm384_vm9, %v318_v39  ;;  %v343_v52 = vpop.permute.xlu1 %342 }
 0x552   :  { %2280 = vmatprep.mubr.msk.f32.mxu0 %vm2564_vm8, %v2562_v30 }
 0x553   :  { %335 = vrot.lane.b32.xlu1 %v333_v50, %s2569_s10 }
 0x555   :  { %v347_v54 = vpop.permute.xlu1 %346 }
 0x5b0   :  { %v612_v55 = vpop.permute.xlu0 %611 }
 0x5b1   :  { %2284 = vmatpush3.xpose.msk.msra.mxu1 %vm384_vm9, %v612_v55 }
 0x5b2   :  { %2293 = vmatprep.subr.mxu1 %v2562_v30 }
 0x5b4   :  { %2286 = vmatmul.mubr.msk.f32.vlgmr.msra.gmra.mrb[6].mxu1 %vm384_vm9, %v345_v51  ;;  %v764_v56 = vpop.permute.xlu0 %763  ;;  %v536_v57 = vpop.permute.xlu1 %535 }
 0x5b5   :  { %2279 = vmatpush3.xpose.msk.msra.mxu0 %vm384_vm9, %v536_v57  ;;  %2294 = vmatpush3.xpose.msk.msra.mxu1 %vm384_vm9, %v764_v56 }
 0x5b6   :  { %2295 = vmatprep.mubr.msk.f32.mxu1 %vm2564_vm8, %v2562_v30  ;;  %2303 = vmatprep.subr.mxu1 %v2562_v30 }
 0x5b7   :  { %2288 = vmatprep.subr.mxu0 %v2562_v30 }
 0x5b8   :  { %2296 = vmatmul.mubr.msk.f32.vlgmr.msra.gmra.mrb[8].mxu1 %vm384_vm9, %v349_v53  ;;  %v916_v58 = vpop.permute.xlu0 %915  ;;  %2281 = vmatmul.mubr.msk.f32.vlgmr.msra.gmra.mrb[2].mxu0 %vm384_vm9, %v343_v52 }
 0x5b9   :  { %v688_v59 = vpop.permute.xlu1 %687  ;;  %2304 = vmatpush3.xpose.msk.msra.mxu1 %vm384_vm9, %v916_v58  ;;  %2290 = vmatprep.mubr.msk.f32.mxu0 %vm2564_vm8, %v2562_v30 }
 0x5ba   :  { %2289 = vmatpush3.xpose.msk.msra.mxu0 %vm384_vm9, %v688_v59  ;;  %2305 = vmatprep.mubr.msk.f32.mxu1 %vm2564_vm8, %v2562_v30 }
 0x5bb   :  { %2298 = vmatprep.subr.mxu0 %v2562_v30  ;;  %2313 = vmatprep.subr.mxu1 %v2562_v30 }
 0x5bc   :  { %v353_v60 = vpop.permute.xlu0 %352 }
 0x5bd   :  { %2291 = vmatmul.mubr.msk.f32.vlgmr.msra.gmra.mrb[4].mxu0 %vm384_vm9, %v347_v54  ;;  %v840_v61 = vpop.permute.xlu1 %839  ;;  %2306 = vmatmul.mubr.msk.f32.vlgmr.msra.gmra.mrb[10].mxu1 %vm384_vm9, %v353_v60 }
 0x5be   :  { %2299 = vmatpush3.xpose.msk.msra.mxu0 %vm384_vm9, %v840_v61  ;;  %2300 = vmatprep.mubr.msk.f32.mxu0 %vm2564_vm8, %v2562_v30 }
 0x5bf   :  { %2308 = vmatprep.subr.mxu0 %v2562_v30  ;;  %2315 = vmatprep.mubr.msk.f32.mxu1 %vm2564_vm8, %v2562_v30 }
 0x5c1   :  { %v351_v62 = vpop.permute.xlu1 %350 }
 0x5c2   :  { %2301 = vmatmul.mubr.msk.f32.vlgmr.msra.gmra.mrb[6].mxu0 %vm384_vm9, %v351_v62 }
 0x5c3   :  { %2310 = vmatprep.mubr.msk.f32.mxu0 %vm2564_vm8, %v2562_v30 }
 0x5c5   :  { %v336_v36 = vpop.permute.xlu1 %335 }
 0x5c6   :  { %v339_v37 = vadd.f32 %v2665_v31, %v336_v36  ;;  %v338_v38 = vadd.f32 %v336_v36, %v2672_v34 }
 0x61c   :  { %v2738_v63 = vpop.f32.mrb[4].mxu1 }
 0x61d   :  { %v2277_v0 = vpop.f32.mrb[5].mxu1  ;;  %v994_v1 = vsel %vm384_vm9, %v2738_v63, -inf }
 0x61e   :  { %995 = vmax.xlane.f32.xlu1 %v994_v1 }
 0x624   :  { %v2742_v4 = vpop.f32.mrb[0].mxu0 }
 0x625   :  { %v2272_v7 = vpop.f32.mrb[1].mxu0  ;;  %v991_v10 = vsel %vm384_vm9, %v2742_v4, -inf }
 0x626   :  { %992 = vmax.xlane.f32.xlu0 %v991_v10 }
 0x687   :  { %v2746_v11 = vpop.f32.mrb[6].mxu1 }
 0x688   :  { %v2287_v12 = vpop.f32.mrb[7].mxu1  ;;  %v1000_v13 = vsel %vm384_vm9, %v2746_v11, -inf }
 0x689   :  { %1001 = vmax.xlane.f32.xlu0 %v1000_v13 }
 0x68b   :  { %v607_v14 = vpop.f32.mrb[2].mxu0  ;;  %v2750_v15 = vpop.f32.mrb[8].mxu1 }
 0x68c   :  { %v2282_v16 = vpop.f32.mrb[3].mxu0  ;;  %v2297_v17 = vpop.f32.mrb[9].mxu1  ;;  %v1006_v18 = vsel %vm384_vm9, %v2750_v15, -inf  ;;  %v997_v19 = vsel %vm384_vm9, %v607_v14, -inf }
 0x68d   :  { %1007 = vmax.xlane.f32.xlu1 %v1006_v18  ;;  %998 = vmax.xlane.f32.xlu0 %v997_v19 }
 0x690   :  { %v759_v20 = vpop.f32.mrb[4].mxu0  ;;  %v2755_v21 = vpop.f32.mrb[10].mxu1 }
 0x691   :  { %v2292_v22 = vpop.f32.mrb[5].mxu0  ;;  %v2307_v23 = vpop.f32.mrb[11].mxu1  ;;  %v1003_v24 = vsel %vm384_vm9, %v759_v20, -inf  ;;  %v1012_v25 = vsel %vm384_vm9, %v2755_v21, -inf }
 0x692   :  { %1004 = vmax.xlane.f32.xlu0 %v1003_v24  ;;  %1013 = vmax.xlane.f32.xlu1 %v1012_v25 }
 0x695   :  { %v911_v26 = vpop.f32.mrb[6].mxu0 }
 0x696   :  { %v2302_v29 = vpop.f32.mrb[7].mxu0  ;;  %v1009_v33 = vsel %vm384_vm9, %v911_v26, -inf }
 0x697   :  { %1010 = vmax.xlane.f32.xlu0 %v1009_v33 }
 0x6a3   :  { %372 = vrot.lane.b32.xlu1 %v339_v37, %s2566_s7 }
 0x6a7   :  { %374 = vrot.lane.b32.xlu1 %v338_v38, %s2565_s6 }
 0x6ab   :  { %376 = vrot.lane.b32.xlu1 %v339_v37, %s2565_s6  ;;  %v996_v31 = vpop.xlane.xlu1 %995 }
 0x6ac   :  { %v1016_v62 = vsub.f32 %v2738_v63, %v996_v31 }
 0x6ad   :  { %370 = vrot.lane.b32.xlu0 %v338_v38, %s2566_s7 }
 0x6ae   :  { %v1025_v7 = vmul.f32 1.442695, %v1016_v62 }
 0x6af   :  { %380 = vrot.lane.b32.xlu1 %v339_v37, %s2567_s8 }
 0x6b1   :  { %378 = vrot.lane.b32.xlu0 %v338_v38, %s2567_s8 }
 0x6b3   :  { %1155 = vrot.lane.b32.xlu1 %v339_v37, %s2569_s10  ;;  %v993_v39 = vpop.xlane.xlu0 %992 }
 0x6b4   :  { %v1015_v54 = vsub.f32 %v2742_v4, %v993_v39 }
 0x6b5   :  { %1079 = vrot.lane.b32.xlu0 %v338_v38, %s2569_s10 }
 0x6b6   :  { %v1023_v56 = vmul.f32 1.442695, %v1015_v54 }
 0x6b8   :  { %2466 = vpow2.f32 %v1023_v56 }
 0x6c2   :  { %v2467_v4 = vpop.eup %2466 }
 0x716   :  { %v1002_v40 = vpop.xlane.xlu0 %1001 }
 0x717   :  { %v1018_v57 = vsub.f32 %v2746_v11, %v1002_v40  ;;  %v1039_v11 = vsel %vm384_vm9, %v2467_v4, 0.0 }
 0x719   :  { %v1029_v58 = vmul.f32 1.442695, %v1018_v57 }
 0x71a   :  { %v999_v41 = vpop.xlane.xlu0 %998  ;;  %v1008_v42 = vpop.xlane.xlu1 %1007 }
 0x71b   :  { %v1017_v59 = vsub.f32 %v607_v14, %v999_v41  ;;  %2468 = vpow2.f32 %v1029_v58  ;;  %v1020_v10 = vsub.f32 %v2750_v15, %v1008_v42 }
 0x71d   :  { %v1027_v60 = vmul.f32 1.442695, %v1017_v59  ;;  %v1033_v14 = vmul.f32 1.442695, %v1020_v10  ;;  %v2457_v10 = vpack.i.bf16 %v2641_v6, %v2639_v5 }
 0x71f   :  { %v1005_v34 = vpop.xlane.xlu0 %1004  ;;  %v1014_v43 = vpop.xlane.xlu1 %1013  ;;  %2470 = vpow2.f32 %v1027_v60 }
 0x720   :  { %v1019_v61 = vsub.f32 %v759_v20, %v1005_v34  ;;  %v1022_v16 = vsub.f32 %v2755_v21, %v1014_v43 }
 0x722   :  { %v1031_v0 = vmul.f32 1.442695, %v1019_v61  ;;  %v1037_v18 = vmul.f32 1.442695, %v1022_v16 }
 0x723   :  { %v373_v44 = vpop.permute.xlu1 %372 }
 0x724   :  { %v1011_v45 = vpop.xlane.xlu0 %1010  ;;  %2472 = vpow2.f32 %v1031_v0 }
 0x725   :  { %v1021_v1 = vsub.f32 %v911_v26, %v1011_v45  ;;  %v2782_v13 = vpop.eup %2468  ;;  %2474 = vpow2.f32 %v1025_v7  ;;  %v2452_v7 = vpack.i.bf16 %v2635_v3, %v2633_v2 }
 0x726   :  { %v1048_v63 = vsel %vm384_vm9, %v2782_v13, 0.0 }
 0x727   :  { %v375_v46 = vpop.permute.xlu1 %374  ;;  %v1035_v12 = vmul.f32 1.442695, %v1021_v1 }
 0x728   :  { %v371_v49 = vpop.permute.xlu0 %370  ;;  %1383 = vrot.lane.b32.xlu0 %v375_v46, %s2569_s10 }
 0x729   :  { %1231 = vrot.lane.b32.xlu1 %v371_v49, %s2569_s10  ;;  %2476 = vpow2.f32 %v1035_v12  ;;  %v2471_v17 = vpop.eup %2470 }
 0x72a   :  { %2478 = vpow2.f32 %v1033_v14  ;;  %v1045_v15 = vsel %vm384_vm9, %v2471_v17, 0.0 }
 0x72b   :  { %v377_v50 = vpop.permute.xlu1 %376  ;;  %2480 = vpow2.f32 %v1037_v18 }
 0x72c   :  { %v379_v51 = vpop.permute.xlu0 %378 }
 0x72d   :  { %1307 = vrot.lane.b32.xlu1 %v373_v44, %s2569_s10 }
 0x72e   :  { %v2473_v19 = vpop.eup %2472 }
 0x72f   :  { %v381_v52 = vpop.permute.xlu1 %380  ;;  %v2475_v20 = vpop.eup %2474  ;;  %v1051_v22 = vsel %vm384_vm9, %v2473_v19, 0.0 }
 0x730   :  { %v1080_v53 = vpop.permute.xlu0 %1079  ;;  %v1042_v21 = vsel %vm384_vm9, %v2475_v20, 0.0 }
 0x731   :  { %2309 = vmatpush3.msra.mxu0 %v1080_v53  ;;  %1459 = vrot.lane.b32.xlu1 %v377_v50, %s2569_s10 }
 0x732   :  { %2318 = vmatprep.subr.mxu0 %v2562_v30 }
 0x733   :  { %v1156_v55 = vpop.permute.xlu1 %1155  ;;  %v2477_v23 = vpop.eup %2476 }
 0x734   :  { %2314 = vmatpush3.msra.mxu1 %v1156_v55  ;;  %v2790_v24 = vpop.eup %2478  ;;  %v1057_v25 = vsel %vm384_vm9, %v2477_v23, 0.0 }
 0x735   :  { %2323 = vmatprep.subr.mxu1 %v2562_v30  ;;  %v1054_v26 = vsel %vm384_vm9, %v2790_v24, 0.0  ;;  %v2795_v29 = vpop.eup %2480 }
 0x736   :  { %v1060_v33 = vsel %vm384_vm9, %v2795_v29, 0.0 }
 0x747   :  { %1040 = vadd.xlane.f32.xlu0 %v1039_v11 }
 0x74b   :  { %1049 = vadd.xlane.f32.xlu0 %v1048_v63 }
 0x74f   :  { %1046 = vadd.xlane.f32.xlu0 %v1045_v15 }
 0x753   :  { %1052 = vadd.xlane.f32.xlu0 %v1051_v22 }
 0x755   :  { %1043 = vadd.xlane.f32.xlu1 %v1042_v21 }
 0x757   :  { %1058 = vadd.xlane.f32.xlu0 %v1057_v25 }
 0x759   :  { %1055 = vadd.xlane.f32.xlu1 %v1054_v26 }
 0x75d   :  { %1061 = vadd.xlane.f32.xlu1 %v1060_v33 }
 0x76d   :  { %1535 = vrot.lane.b32.xlu0 %v379_v51, %s2569_s10 }
 0x76e   :  { %1611 = vrot.lane.b32.xlu1 %v381_v52, %s2569_s10 }
 0x771   :  { %2453 = vrot.lane.b32.xlu0 %v2452_v7, %s2563_s1 }
 0x772   :  { %2458 = vrot.lane.b32.xlu1 %v2457_v10, %s2563_s1  ;;  %v89_v10 = vld [vmem:[#allocation4 + $0x28] sm:$0xff] }
 0x79a   :  { %v1384_v36 = vpop.permute.xlu0 %1383 }
 0x79b   :  { %v1232_v37 = vpop.permute.xlu1 %1231 }
 0x79f   :  { %v1308_v39 = vpop.permute.xlu1 %1307 }
 0x7a3   :  { %v1460_v41 = vpop.permute.xlu1 %1459 }
 0x7d4   :  { %v1041_v38 = vpop.xlane.xlu0 %1040 }
 0x7d5   :  { %2482 = vrcp.f32 %v1041_v38 }
 0x7d8   :  { %v1050_v31 = vpop.xlane.xlu0 %1049 }
 0x7dc   :  { %v1047_v40 = vpop.xlane.xlu0 %1046 }
 0x7dd   :  { %2484 = vrcp.f32 %v1047_v40 }
 0x7df   :  { %v2483_v42 = vpop.eup %2482 }
 0x7e0   :  { %v1071_v34 = vmul.f32 %v2483_v42, %v2467_v4  ;;  %v1053_v43 = vpop.xlane.xlu0 %1052 }
 0x7e1   :  { %2486 = vrcp.f32 %v1053_v43 }
 0x7e2   :  { %v1044_v44 = vpop.xlane.xlu1 %1043  ;;  %2311 = vmatmul.mubr.msk.f32.vlgmr.msra.gmra.mrb[8].mxu0 %vm384_vm9, %v1071_v34 }
 0x7e3   :  { %2488 = vrcp.f32 %v1044_v44  ;;  %2319 = vmatpush3.msra.mxu0 %v1232_v37  ;;  %2320 = vmatprep.mubr.msk.f32.mxu0 %vm2564_vm8, %v2562_v30 }
 0x7e4   :  { %2490 = vrcp.f32 %v1050_v31  ;;  %v1059_v45 = vpop.xlane.xlu0 %1058  ;;  %2328 = vmatprep.subr.mxu0 %v2562_v30 }
 0x7e5   :  { %2492 = vrcp.f32 %v1059_v45 }
 0x7e6   :  { %v1056_v46 = vpop.xlane.xlu1 %1055 }
 0x7e7   :  { %v2485_v49 = vpop.eup %2484  ;;  %2494 = vrcp.f32 %v1056_v46  ;;  %v1721_v46 = vsub.s32 3, %v2619_v32 }
 0x7e8   :  { %v1073_v50 = vmul.f32 %v2485_v49, %v2471_v17  ;;  %v1536_v57 = vpop.permute.xlu0 %1535 }
 0x7e9   :  { %v1722_v49 = vrot.slane %v2647_v9, %v1721_v46 }
 0x7ea   :  { %v1062_v51 = vpop.xlane.xlu1 %1061  ;;  %2321 = vmatmul.mubr.msk.f32.vlgmr.msra.gmra.mrb[10].mxu0 %vm384_vm9, %v1073_v50 }
 0x7eb   :  { %v2487_v52 = vpop.eup %2486  ;;  %2329 = vmatpush3.msra.mxu0 %v1384_v36  ;;  %2330 = vmatprep.mubr.msk.f32.mxu0 %vm2564_vm8, %v2562_v30  ;;  %2496 = vrcp.f32 %v1062_v51 }
 0x7ec   :  { %v1075_v53 = vmul.f32 %v2487_v52, %v2473_v19  ;;  %2338 = vmatprep.subr.mxu0 %v2562_v30  ;;  %v2454_v12 = vpop.permute.xlu0 %2453 }
 0x7ed   :  { %v2489_v54 = vpop.eup %2488  ;;  %v2456_v11 = vunpack.i.h.bf16 %v2454_v12 }
 0x7ee   :  { %v2491_v55 = vpop.eup %2490  ;;  %v1072_v56 = vmul.f32 %v2489_v54, %v2475_v20  ;;  %2331 = vmatmul.mubr.msk.f32.vlgmr.msra.gmra.mrb[12].mxu0 %vm384_vm9, %v1075_v53  ;;  %v1612_v1 = vpop.permute.xlu1 %1611 }
 0x7ef   :  { %v2493_v58 = vpop.eup %2492  ;;  %2339 = vmatpush3.msra.mxu0 %v1536_v57  ;;  %2340 = vmatprep.mubr.msk.f32.mxu0 %vm2564_vm8, %v2562_v30  ;;  %v1074_v60 = vmul.f32 %v2491_v55, %v2782_v13  ;;  %v2455_v13 = vunpack.i.l.bf16 %v2454_v12 }
 0x7f0   :  { %v1077_v59 = vmul.f32 %v2493_v58, %v2477_v23  ;;  %2316 = vmatmul.mubr.msk.f32.vlgmr.msra.gmra.mrb[12].mxu1 %vm384_vm9, %v1072_v56 }
 0x7f1   :  { %2324 = vmatpush3.msra.mxu1 %v1308_v39  ;;  %2325 = vmatprep.mubr.msk.f32.mxu1 %vm2564_vm8, %v2562_v30  ;;  %v2495_v61 = vpop.eup %2494  ;;  %v2405_v14 = vpack.c.bf16 %v2456_v11, %v2455_v13  ;;  %v90_v11 = vld [vmem:[#allocation4 + $0x30] sm:$0xff]  ;;  %v91_v13 = vld [vmem:[#allocation4 + $0x38] sm:$0xff] }
 0x7f2   :  { %2333 = vmatprep.subr.mxu1 %v2562_v30  ;;  %2341 = vmatmul.mubr.msk.f32.vlgmr.msra.gmra.mrb[14].mxu0 %vm384_vm9, %v1077_v59  ;;  %v1076_v62 = vmul.f32 %v2495_v61, %v2790_v24  ;;  %v2459_v16 = vpop.permute.xlu1 %2458 }
 0x7f3   :  { %2406 = vmatprep.subr.bf16.mxu0 %v2405_v14  ;;  %v2461_v17 = vunpack.i.h.bf16 %v2459_v16  ;;  %v2460_v18 = vunpack.i.l.bf16 %v2459_v16 }
 0x7f4   :  { %2326 = vmatmul.mubr.msk.f32.vlgmr.msra.gmra.mrb[14].mxu1 %vm384_vm9, %v1074_v60  ;;  %2408 = vmatpush3.bf16.msra.mxu0 %v2405_v14  ;;  %v2417_v14 = vpack.c.bf16 %v91_v13, %v90_v11 }
 0x7f5   :  { %2334 = vmatpush3.msra.mxu1 %v1460_v41  ;;  %2335 = vmatprep.mubr.msk.f32.mxu1 %vm2564_vm8, %v2562_v30  ;;  %v2497_v0 = vpop.eup %2496  ;;  %v2409_v15 = vpack.c.bf16 %v2461_v17, %v2460_v18 }
 0x7f6   :  { %2343 = vmatprep.subr.mxu1 %v2562_v30  ;;  %v1078_v4 = vmul.f32 %v2497_v0, %v2795_v29 }
 0x7f7   :  { %2410 = vmatprep.subr.bf16.mxu0 %v2409_v15 }
 0x7f8   :  { %2336 = vmatmul.mubr.msk.f32.vlgmr.msra.gmra.mrb[16].mxu1 %vm384_vm9, %v1076_v62  ;;  %2412 = vmatpush3.bf16.msra.mxu0 %v2409_v15 }
 0x7f9   :  { %2344 = vmatpush3.msra.mxu1 %v1612_v1  ;;  %2345 = vmatprep.mubr.msk.f32.mxu1 %vm2564_vm8, %v2562_v30 }
 0x7fc   :  { %2346 = vmatmul.mubr.msk.f32.vlgmr.msra.gmra.mrb[18].mxu1 %vm384_vm9, %v1078_v4 }
 0x8b5   :  { %v1151_v30 = vpop.f32.mrb[8].mxu0 }
 0x8b6   :  { %v2312_v63 = vpop.f32.mrb[9].mxu0 }
 0x8bd   :  { %v1303_v2 = vpop.f32.mrb[10].mxu0 }
 0x8be   :  { %1689 = vrot.lane.b32.xlu0 %v1303_v2, %s2560_s20  ;;  %v2322_v3 = vpop.f32.mrb[11].mxu0  ;;  %v2850_v2 = vld [vmem:[#allocation4 + $0xb0] sm:$0xff] }
 0x8bf   :  { %v1851_v3 = vrot.slane %v2850_v2, %v316_v35  ;;  %v94_v35 = vld [vmem:[#allocation4 + $0x50] sm:$0xff] }
 0x8c1   :  { %v1455_v5 = vpop.f32.mrb[12].mxu0 }
 0x8c2   :  { %1697 = vrot.lane.b32.xlu0 %v1455_v5, %s2570_s11  ;;  %v2332_v6 = vpop.f32.mrb[13].mxu0 }
 0x8c3   :  { %v1227_v19 = vpop.f32.mrb[12].mxu1  ;;  %v1857_v6 = vrot.slane %v2850_v2, %v322_v8  ;;  %v96_v8 = vld [vmem:[#allocation4 + $0x60] sm:$0xff] }
 0x8c4   :  { %v2317_v20 = vpop.f32.mrb[13].mxu1 }
 0x8c5   :  { %v1607_v22 = vpop.f32.mrb[14].mxu0 }
 0x8c6   :  { %1705 = vrot.lane.b32.xlu0 %v1607_v22, %s2571_s12  ;;  %v2342_v23 = vpop.f32.mrb[15].mxu0 }
 0x8c7   :  { %v1379_v21 = vpop.f32.mrb[14].mxu1 }
 0x8c8   :  { %1691 = vrot.lane.b32.xlu1 %v1379_v21, %s2560_s20  ;;  %v2327_v24 = vpop.f32.mrb[15].mxu1 }
 0x8cb   :  { %v1531_v25 = vpop.f32.mrb[16].mxu1 }
 0x8cc   :  { %1699 = vrot.lane.b32.xlu1 %v1531_v25, %s2570_s11  ;;  %v2337_v26 = vpop.f32.mrb[17].mxu1 }
 0x8cd   :  { %v92_v26 = vld [vmem:[#allocation4 + $0x40] sm:$0xff] }
 0x8cf   :  { %v1683_v29 = vpop.f32.mrb[18].mxu1 }
 0x8d0   :  { %1707 = vrot.lane.b32.xlu1 %v1683_v29, %s2571_s12  ;;  %v2347_v33 = vpop.f32.mrb[19].mxu1  ;;  %v93_v29 = vld [vmem:[#allocation4 + $0x48] sm:$0xff] }
 0x8d1   :  { %v2421_v33 = vpack.c.bf16 %v93_v29, %v92_v26 }
 0x8d3   :  { %2422 = vmatprep.subr.bf16.mxu0 %v2421_v33 }
 0x930   :  { %v1690_v36 = vpop.permute.xlu0 %1689 }
 0x931   :  { %v1711_v38 = vsel %vm384_vm9, %v1151_v30, %v1690_v36  ;;  %v95_v36 = vld [vmem:[#allocation4 + $0x58] sm:$0xff] }
 0x934   :  { %v1698_v37 = vpop.permute.xlu0 %1697 }
 0x935   :  { %v1714_v39 = vsel %vm1713_vm10, %v1711_v38, %v1698_v37  ;;  %v2425_v37 = vpack.c.bf16 %v95_v36, %v94_v35  ;;  %v97_v38 = vld [vmem:[#allocation4 + $0x68] sm:$0xff]  ;;  %v2080_v35 = vrot.slane %v2850_v2, %v332_v47 }
 0x938   :  { %v1706_v31 = vpop.permute.xlu0 %1705 }
 0x939   :  { %v1717_v40 = vsel %vm1716_vm11, %v1714_v39, %v1706_v31  ;;  %v2429_v39 = vpack.c.bf16 %v97_v38, %v96_v8  ;;  %v98_v31 = vld [vmem:[#allocation4 + $0x70] sm:$0xff] }
 0x93a   :  { %v1692_v41 = vpop.permute.xlu1 %1691  ;;  %2356 = vmatprep.mubr.msk.f32.mxu0 %vm43_vm0, %v1717_v40  ;;  %v99_v40 = vld [vmem:[#allocation4 + $0x78] sm:$0xff] }
 0x93b   :  { %v1712_v34 = vsel %vm384_vm9, %v1227_v19, %v1692_v41  ;;  %v2433_v41 = vpack.c.bf16 %v99_v40, %v98_v31 }
 0x93e   :  { %v1700_v42 = vpop.permute.xlu1 %1699 }
 0x93f   :  { %v1715_v43 = vsel %vm1713_vm10, %v1712_v34, %v1700_v42  ;;  %v1862_v42 = vsub.s32 4, %v2619_v32 }
 0x941   :  { %v1863_v34 = vrot.slane %v2647_v9, %v1862_v42 }
 0x942   :  { %v1708_v44 = vpop.permute.xlu1 %1707 }
 0x943   :  { %v1718_v45 = vsel %vm1716_vm11, %v1715_v43, %v1708_v44 }
 0x944   :  { %2357 = vmatmul.mubr.msk.f32.vlgmr.msra.gmra.mrb[16].mxu0 %vm43_vm0, %v1718_v45 }
 0x945   :  { %2424 = vmatpush3.bf16.msra.mxu0 %v2421_v33 }
 0x946   :  { %2426 = vmatprep.subr.bf16.mxu0 %v2425_v37 }
 0x949   :  { %2428 = vmatpush3.bf16.msra.mxu0 %v2425_v37  ;;  %v2572_v37 = vmov 1966171168  }
 0x94a   :  { %2430 = vmatprep.subr.bf16.mxu0 %v2429_v39  ;;  %v2111_v8 = vunpack.c.l.s4 %v2572_v37 }
 0x94c   :  { %v2112_v42 = vunpack.c.0.s8 %v2111_v8 }
 0x94d   :  { %2432 = vmatpush3.bf16.msra.mxu0 %v2429_v39  ;;  %v2086_v39 = vrot.slane %v2850_v2, %v1721_v46 }
 0x94e   :  { %2434 = vmatprep.subr.bf16.mxu0 %v2433_v41 }
 0x951   :  { %2436 = vmatpush3.bf16.msra.mxu0 %v2433_v41 }
 0xa17   :  { %v2358_v50 = vpop.f32.mrb[16].mxu0 }
 0xa18   :  { %v1817_v51 = vadd.f32 %v2358_v50, %v1722_v49  ;;  %v1811_v52 = vpop.f32.mrb[17].mxu0 }
 0xa19   :  { %v1812_v53 = vadd.f32 %v1811_v52, %v1722_v49 }
 0xa1a   :  { %v1821_v54 = vadd.f32 %v1817_v51, %v2659_v28 }
 0xa1b   :  { %v1820_v55 = vadd.f32 %v1812_v53, %v2657_v27  ;;  %v88_v27 = vld [vmem:[#allocation4 + $0x20] sm:$0xff] }
 0xa1c   :  { %v1825_v56 = vsel %vm43_vm0, %v1821_v54, 0.0  ;;  %v2413_v12 = vpack.c.bf16 %v89_v10, %v88_v27  ;;  %v1965_v27 = vsub.s32 5, %v2619_v32 }
 0xa1d   :  { %1826 = vadd.xlane.f32.xlu1 %v1825_v56  ;;  %v1822_v57 = vsel %vm43_vm0, %v1820_v55, 0.0 }
 0xa1e   :  { %1823 = vadd.xlane.f32.xlu0 %v1822_v57  ;;  %2414 = vmatprep.subr.bf16.mxu1 %v2413_v12  ;;  %v1966_v10 = vrot.slane %v2647_v9, %v1965_v27 }
 0xa1f   :  { %2416 = vmatpush3.bf16.msra.mxu1 %v2413_v12 }
 0xa20   :  { %2418 = vmatprep.subr.bf16.mxu1 %v2417_v14 }
 0xa23   :  { %2420 = vmatpush3.bf16.msra.mxu1 %v2417_v14 }
 0xaaa   :  { %v1827_v58 = vpop.xlane.xlu1 %1826 }
 0xaab   :  { %v1829_v59 = vmul.f32 0.03125, %v1827_v58  ;;  %v1824_v60 = vpop.xlane.xlu0 %1823 }
 0xaac   :  { %v1828_v61 = vmul.f32 0.03125, %v1824_v60 }
 0xaad   :  { %v1831_v62 = vsub.f32 %v1821_v54, %v1829_v59 }
 0xaae   :  { %v1830_v0 = vsub.f32 %v1820_v55, %v1828_v61 }
 0xaaf   :  { %v1833_v7 = vmul.f32 %v1831_v62, %v1831_v62 }
 0xab0   :  { %v1832_v1 = vmul.f32 %v1830_v0, %v1830_v0 }
 0xab1   :  { %v1837_v28 = vsel %vm43_vm0, %v1833_v7, 0.0 }
 0xab2   :  { %v1834_v4 = vsel %vm43_vm0, %v1832_v1, 0.0 }
 0xab3   :  { %1835 = vadd.xlane.f32.xlu0 %v1834_v4 }
 0xab7   :  { %1838 = vadd.xlane.f32.xlu0 %v1837_v28 }
 0xb40   :  { %v1836_v30 = vpop.xlane.xlu0 %1835 }
 0xb41   :  { %v1840_v16 = vmul.f32 0.03125, %v1836_v30 }
 0xb43   :  { %v1842_v63 = vadd.f32 1e-12, %v1840_v16 }
 0xb44   :  { %v1839_v17 = vpop.xlane.xlu0 %1838 }
 0xb45   :  { %2498 = vrsqrt.f32 %v1842_v63  ;;  %v1841_v18 = vmul.f32 0.03125, %v1839_v17 }
 0xb47   :  { %v1843_v15 = vadd.f32 1e-12, %v1841_v18 }
 0xb49   :  { %2500 = vrsqrt.f32 %v1843_v15 }
 0xb4f   :  { %v2499_v5 = vpop.eup %2498 }
 0xb50   :  { %v1846_v19 = vmul.f32 %v2499_v5, %v1830_v0 }
 0xb52   :  { %v1852_v20 = vmul.f32 %v1851_v3, %v1846_v19 }
 0xb53   :  { %v2501_v22 = vpop.eup %2500 }
 0xb54   :  { %v1847_v23 = vmul.f32 %v2501_v22, %v1831_v62  ;;  %v1858_v21 = vadd.f32 %v1857_v6, %v1852_v20 }
 0xb56   :  { %2367 = vmatprep.mubr.msk.f32.mxu1 %vm43_vm0, %v1858_v21  ;;  %v1853_v24 = vmul.f32 %v1851_v3, %v1847_v23 }
 0xb58   :  { %v1859_v25 = vadd.f32 %v1857_v6, %v1853_v24 }
 0xb5a   :  { %2368 = vmatmul.mubr.msk.f32.vlgmr.msra.gmra.mrb[20].mxu1 %vm43_vm0, %v1859_v25 }
 0xc2d   :  { %v2369_v43 = vpop.f32.mrb[20].mxu1 }
 0xc2e   :  { %v1942_v44 = vadd.f32 %v2369_v43, %v1863_v34  ;;  %v1936_v45 = vpop.f32.mrb[21].mxu1 }
 0xc2f   :  { %v1937_v49 = vadd.f32 %v1936_v45, %v1863_v34 }
 0xc30   :  { %v1946_v50 = vmul.f32 %v1942_v44, %v1942_v44 }
 0xc31   :  { %v1945_v51 = vmul.f32 %v1937_v49, %v1937_v49 }
 0xc32   :  { %v1948_v52 = vmul.f32 %v1946_v50, %v1942_v44 }
 0xc33   :  { %v1947_v53 = vmul.f32 %v1945_v51, %v1937_v49 }
 0xc34   :  { %v1950_v54 = vmul.f32 0.044715, %v1948_v52 }
 0xc35   :  { %v1949_v55 = vmul.f32 0.044715, %v1947_v53 }
 0xc36   :  { %v1952_v56 = vadd.f32 %v1950_v54, %v1942_v44 }
 0xc37   :  { %v1951_v57 = vadd.f32 %v1949_v55, %v1937_v49 }
 0xc38   :  { %v1954_v58 = vmul.f32 0.7978846, %v1952_v56 }
 0xc39   :  { %v1953_v59 = vmul.f32 0.7978846, %v1951_v57 }
 0xc3a   :  { %2502 = vtanh.f32 %v1954_v58 }
 0xc3b   :  { %2504 = vtanh.f32 %v1953_v59 }
 0xc44   :  { %v2503_v60 = vpop.eup %2502 }
 0xc45   :  { %v2505_v61 = vpop.eup %2504  ;;  %v1958_v62 = vadd.f32 1.0, %v2503_v60 }
 0xc46   :  { %v1957_v0 = vadd.f32 1.0, %v2505_v61 }
 0xc47   :  { %v1960_v1 = vmul.f32 0.5, %v1958_v62 }
 0xc48   :  { %v1959_v4 = vmul.f32 0.5, %v1957_v0 }
 0xc49   :  { %v1962_v28 = vmul.f32 %v1960_v1, %v1942_v44 }
 0xc4a   :  { %v1961_v7 = vmul.f32 %v1959_v4, %v1937_v49  ;;  %v2115_v49 = vsub.s32 %v2112_v42, %v2619_v32 }
 0xc4c   :  { %2386 = vmatprep.mubr.msk.f32.mxu0 %vm1967_vm12, %v1961_v7 }
 0xc4d   :  { %2387 = vmatmul.mubr.msk.f32.vlgmr.msra.gmra.mrb[18].mxu0 %vm1967_vm12, %v1962_v28 }
 0xd20   :  { %v2388_v12 = vpop.f32.mrb[18].mxu0 }
 0xd21   :  { %v2046_v11 = vadd.f32 %v2388_v12, %v1966_v10  ;;  %v2040_v13 = vpop.f32.mrb[19].mxu0 }
 0xd22   :  { %v2041_v14 = vadd.f32 %v2040_v13, %v1966_v10 }
 0xd23   :  { %v2050_v30 = vadd.f32 %v2046_v11, %v1859_v25 }
 0xd24   :  { %v2049_v16 = vadd.f32 %v2041_v14, %v1858_v21 }
 0xd25   :  { %v2054_v63 = vsel %vm43_vm0, %v2050_v30, 0.0 }
 0xd26   :  { %2055 = vadd.xlane.f32.xlu0 %v2054_v63  ;;  %v2051_v17 = vsel %vm43_vm0, %v2049_v16, 0.0 }
 0xd27   :  { %2052 = vadd.xlane.f32.xlu1 %v2051_v17 }
 0xdb3   :  { %v2056_v18 = vpop.xlane.xlu0 %2055 }
 0xdb4   :  { %v2058_v15 = vmul.f32 0.03125, %v2056_v18  ;;  %v2053_v3 = vpop.xlane.xlu1 %2052 }
 0xdb5   :  { %v2057_v5 = vmul.f32 0.03125, %v2053_v3 }
 0xdb6   :  { %v2060_v6 = vsub.f32 %v2050_v30, %v2058_v15 }
 0xdb7   :  { %v2059_v19 = vsub.f32 %v2049_v16, %v2057_v5 }
 0xdb8   :  { %v2062_v20 = vmul.f32 %v2060_v6, %v2060_v6 }
 0xdb9   :  { %v2061_v9 = vmul.f32 %v2059_v19, %v2059_v19 }
 0xdba   :  { %v2066_v22 = vsel %vm43_vm0, %v2062_v20, 0.0 }
 0xdbb   :  { %2067 = vadd.xlane.f32.xlu0 %v2066_v22  ;;  %v2063_v23 = vsel %vm43_vm0, %v2061_v9, 0.0 }
 0xdbc   :  { %2064 = vadd.xlane.f32.xlu1 %v2063_v23 }
 0xe48   :  { %v2068_v21 = vpop.xlane.xlu0 %2067 }
 0xe49   :  { %v2070_v24 = vmul.f32 0.03125, %v2068_v21  ;;  %v2065_v25 = vpop.xlane.xlu1 %2064 }
 0xe4a   :  { %v2069_v26 = vmul.f32 0.03125, %v2065_v25 }
 0xe4b   :  { %v2072_v29 = vadd.f32 1e-12, %v2070_v24 }
 0xe4c   :  { %v2071_v33 = vadd.f32 1e-12, %v2069_v26 }
 0xe4d   :  { %2506 = vrsqrt.f32 %v2072_v29 }
 0xe4e   :  { %2508 = vrsqrt.f32 %v2071_v33 }
 0xe57   :  { %v2507_v36 = vpop.eup %2506 }
 0xe58   :  { %v2509_v38 = vpop.eup %2508  ;;  %v2076_v31 = vmul.f32 %v2507_v36, %v2060_v6 }
 0xe59   :  { %v2075_v40 = vmul.f32 %v2509_v38, %v2059_v19 }
 0xe5a   :  { %v2082_v41 = vmul.f32 %v2080_v35, %v2076_v31 }
 0xe5b   :  { %v2081_v34 = vmul.f32 %v2080_v35, %v2075_v40 }
 0xe5c   :  { %v2088_v43 = vadd.f32 %v2086_v39, %v2082_v41 }
 0xe5d   :  { %v2087_v44 = vadd.f32 %v2086_v39, %v2081_v34 }
 0xe5e   :  { %v2091_v45 = vrot.slane %v2088_v43, 7 }
 0xe60   :  { %v2093_v47 = vsel %vm2092_vm6, %v2091_v45, %v2087_v44 }
 0xe61   :  { %v2106_v50 = vsel %vm43_vm0, %v2093_v47, %v2626_v48 }
 0xe62   :  { %v2108_v51 = vsel %vm2107_vm13, %v2106_v50, 0.0 }
 0xe63   :  { %v2116_v52 = vrot.slane %v2108_v51, %v2115_v49 }
 0xe65   :  { %v2117_v53 = vcombine.high %v2116_v52, %v2116_v52  ;;  %2178 = vst.sshfl [vmem:[%s2886_s2] sm:$0x1 pattern:$0x73625140] %v2116_v52 }
 0xe67   :  { %2179 = vst.sshfl [vmem:[%s2886_s2 + $0x1] sm:$0x1 pattern:$0x73625140] %v2117_v53 }
 0xe68   :  { %2140 = vsyncpa [#allocation3], 1 }
 0xe69   :  { %2141 = vsyncpa [#allocation5], 1 }

</bundles_post_ra>
